<compile_context>
chip_gen: v7x
topology: tpu7x:2x2x1
jax: 0.10.0
libtpu: 0.0.40
codegen_flags: <defaults>
</compile_context>

<pallas_src>
import math

import jax
import jax.numpy as jnp
from jax.experimental import pallas as pl
from jax.experimental.pallas import tpu as pltpu


def _vmem_limit_bytes():
    """Per-generation VMEM budget: ~75% of physical (v5e/v6e 128 MiB, v7x 64 MiB), capped."""
    try:
        cap = int(pltpu.get_tpu_info().vmem_capacity_bytes)
    except Exception:
        return 48 * 1024 * 1024
    return max(32 * 1024 * 1024, min(100 * 1024 * 1024, (cap * 3) // 4))


# ---------------------------------------------------------------------------
# Kernel A: fused QKV projection.  One (tt, C) @ (C, 3C) GEMM per step against
# the resident weight; results are stored head-major as (B, H, T, hd) bf16 so
# Kernel B never lane-slices activations.  The softmax scale is pre-folded
# into the Q columns of the weight/bias in the wrapper.
# ---------------------------------------------------------------------------
def _make_qkv_proj_kernel(n_head, head_dim, n_embd):
    def kernel(x_ref, w_ref, b_ref, q_ref, k_ref, v_ref):
        x = x_ref[0]                                                   # (tt, C) bf16
        r = jnp.dot(x, w_ref[...],
                    preferred_element_type=jnp.float32) + b_ref[...]  # (tt, 3C) f32
        for h in range(n_head):                                        # static unroll
            lo = h * head_dim
            q_ref[0, h] = r[:, lo:lo + head_dim].astype(q_ref.dtype)
            k_ref[0, h] = r[:, n_embd + lo:n_embd + lo + head_dim].astype(k_ref.dtype)
            v_ref[0, h] = r[:, 2 * n_embd + lo:2 * n_embd + lo + head_dim].astype(v_ref.dtype)
    return kernel


# ---------------------------------------------------------------------------
# Kernel B: flash attention (online softmax, causal tile skip) with the heads
# unrolled in-kernel and a single aggregated (tq, C) @ (C, C) output
# projection written once per output tile.
# ---------------------------------------------------------------------------
def _make_flash_attn_kernel(n_head, head_dim, tq, tk):
    def kernel(q_ref, k_ref, v_ref, wp_ref, bp_ref, o_ref, m_scr, l_scr, acc_scr):
        qi = pl.program_id(1)      # query-tile index   (parallel)
        ki = pl.program_id(2)      # kv-tile index      (arbitrary / reduction, innermost)

        @pl.when(ki == 0)
        def _init():
            m_scr[...] = jnp.full(m_scr.shape, -jnp.inf, jnp.float32)
            l_scr[...] = jnp.zeros(l_scr.shape, jnp.float32)
            acc_scr[...] = jnp.zeros(acc_scr.shape, jnp.float32)

        def tile_update(apply_mask):
            if apply_mask:
                # Additive causal mask, built once per diagonal step (shared by all heads).
                row = jax.lax.broadcasted_iota(jnp.int32, (tq, tk), 0)
                col = jax.lax.broadcasted_iota(jnp.int32, (tq, tk), 1)
                add_mask = jnp.where(col <= row, 0.0, -1e30).astype(jnp.float32)
            for h in range(n_head):                                    # static unroll
                q = q_ref[0, h]                                        # (tq, hd) bf16 (pre-scaled)
                k = k_ref[0, h]                                        # (tk, hd) bf16
                v = v_ref[0, h]                                        # (tk, hd) bf16
                s = jax.lax.dot_general(                               # q @ k^T, f32 acc
                    q, k, (((1,), (1,)), ((), ())),
                    preferred_element_type=jnp.float32)                # (tq, tk)
                if apply_mask:
                    s = s + add_mask
                m_prev = m_scr[h]                                      # (tq, 1)
                m_new = jnp.maximum(m_prev, jnp.max(s, axis=-1, keepdims=True))
                alpha = jnp.exp(m_prev - m_new)
                p = jnp.exp(s - m_new)
                l_scr[h] = alpha * l_scr[h] + jnp.sum(p, axis=-1, keepdims=True)
                acc_scr[h] = alpha * acc_scr[h] + jnp.dot(
                    p.astype(v.dtype), v, preferred_element_type=jnp.float32)
                m_scr[h] = m_new

        # Strictly-below-diagonal tiles: fully unmasked, no mask work.
        @pl.when(ki < qi)
        def _off_diagonal():
            tile_update(apply_mask=False)

        # Diagonal tile: apply the causal mask; it is also the last tile that contributes
        # to this (batch, q-tile), so normalize, assemble the (tq, C) context and run the
        # aggregated output projection (K = C) exactly once.
        @pl.when(ki == qi)
        def _diagonal_and_finalize():
            tile_update(apply_mask=True)
            ys = [
                (acc_scr[h] * pl.reciprocal(l_scr[h], approx=True)).astype(wp_ref.dtype)
                for h in range(n_head)
            ]
            y = jnp.concatenate(ys, axis=-1)                           # (tq, C) bf16, head-major
            out = jnp.dot(y, wp_ref[...],
                          preferred_element_type=jnp.float32) + bp_ref[...]
            o_ref[0] = out.astype(o_ref.dtype)

        # ki > qi: fully masked tile -> skipped entirely (no compute; K/V index_map is
        # clamped to the diagonal so no new DMA is issued either).

    return kernel


# ---------------------------------------------------------------------------
# Wrapper
# ---------------------------------------------------------------------------
def causal_self_attention(x, w_qkv, b_qkv, w_proj, b_proj, n_head,
                          *, block_q=256, block_t=512,
                          compute_dtype=jnp.bfloat16):
    """GPT-2 causal self-attention forward.  x: (B, T, C) f32 -> (B, T, C) f32.

    Weights follow JAX convention: y = x @ W + b, W_qkv: (C, 3C), W_proj: (C, C).
    """
    B, T, C = x.shape
    H = n_head
    assert C % H == 0
    hd = C // H
    assert C % 128 == 0, "n_embd should be a multiple of 128 (lane-dense output)"
    assert hd % 8 == 0

    tq = tk = min(block_q, T)            # causal tile skipping assumes tq == tk
    tt = min(block_t, T)
    assert T % tq == 0 and T % tt == 0
    assert tq % 8 == 0 and tt % 8 == 0
    n_q, n_k, n_t = T // tq, T // tk, T // tt
    scale = 1.0 / math.sqrt(hd)
    vmem_limit = _vmem_limit_bytes()

    # ---- free (trace-time) parameter layout plumbing -----------------------
    # Fold the softmax scale into the Q columns of the fused QKV weight/bias.
    w_all = jnp.concatenate([w_qkv[:, :C] * scale, w_qkv[:, C:]],
                            axis=1).astype(compute_dtype)              # (C, 3C)
    b_all = jnp.concatenate([b_qkv[:C] * scale, b_qkv[C:]]
                            ).reshape(1, 3 * C).astype(jnp.float32)    # (1, 3C)
    wp = w_proj.astype(compute_dtype)                                  # (C, C)
    bp = b_proj.reshape(1, C).astype(jnp.float32)                      # (1, C)
    xc = x.astype(compute_dtype)

    # ---- Kernel A: fused QKV projection -> head-major (B, H, T, hd) --------
    qkv_struct = jax.ShapeDtypeStruct((B, H, T, hd), compute_dtype)
    q4, k4, v4 = pl.pallas_call(
        _make_qkv_proj_kernel(H, hd, C),
        out_shape=(qkv_struct, qkv_struct, qkv_struct),
        grid_spec=pltpu.PrefetchScalarGridSpec(
            num_scalar_prefetch=0,
            grid=(B, n_t),
            in_specs=[
                pl.BlockSpec((1, tt, C), lambda b, t: (b, t, 0)),      # x tile
                pl.BlockSpec((C, 3 * C), lambda b, t: (0, 0)),         # fused W_qkv (resident)
                pl.BlockSpec((1, 3 * C), lambda b, t: (0, 0)),         # fused bias
            ],
            out_specs=[
                pl.BlockSpec((1, H, tt, hd), lambda b, t: (b, 0, t, 0)),
            ] * 3,
        ),
        compiler_params=pltpu.CompilerParams(
            dimension_semantics=("parallel", "parallel"),
            vmem_limit_bytes=vmem_limit),
    )(xc, w_all, b_all)

    # ---- Kernel B: flash attention + aggregated output projection ----------
    out = pl.pallas_call(
        _make_flash_attn_kernel(H, hd, tq, tk),
        out_shape=jax.ShapeDtypeStruct((B, T, C), jnp.float32),
        grid_spec=pltpu.PrefetchScalarGridSpec(
            num_scalar_prefetch=0,
            grid=(B, n_q, n_k),
            in_specs=[
                pl.BlockSpec((1, H, tq, hd),
                             lambda b, qi, ki: (b, 0, qi, 0)),
                # Clamp the kv-tile index to the diagonal: skipped (fully masked)
                # tiles keep the previous block, so no new DMA is issued.
                pl.BlockSpec((1, H, tk, hd),
                             lambda b, qi, ki: (b, 0, jnp.minimum(ki, qi), 0)),
                pl.BlockSpec((1, H, tk, hd),
                             lambda b, qi, ki: (b, 0, jnp.minimum(ki, qi), 0)),
                pl.BlockSpec((C, C), lambda b, qi, ki: (0, 0)),        # W_proj (resident)
                pl.BlockSpec((1, C), lambda b, qi, ki: (0, 0)),        # b_proj
            ],
            out_specs=pl.BlockSpec((1, tq, C), lambda b, qi, ki: (b, qi, 0)),
            scratch_shapes=[
                pltpu.VMEM((H, tq, 1), jnp.float32),    # running row max m (per head)
                pltpu.VMEM((H, tq, 1), jnp.float32),    # running denominator l (per head)
                pltpu.VMEM((H, tq, hd), jnp.float32),   # un-normalized context acc (per head)
            ],
        ),
        compiler_params=pltpu.CompilerParams(
            dimension_semantics=("parallel", "parallel", "arbitrary"),
            vmem_limit_bytes=vmem_limit),
    )(q4, k4, v4, wp, bp)

    return out.astype(x.dtype)


# ---------------------------------------------------------------------------
# Pure-JAX reference (reproduces the PyTorch forward).
# ---------------------------------------------------------------------------
def causal_self_attention_ref(x, w_qkv, b_qkv, w_proj, b_proj, n_head,
                              compute_dtype=jnp.float32):
    """compute_dtype=bfloat16 mirrors the kernel's matmul-input precision
    (accumulation is always f32), so kernel-vs-reference differences reduce to
    op ordering, the online softmax, scale-folding rounding and the approx reciprocal."""
    B, T, C = x.shape
    hd = C // n_head
    cd = compute_dtype
    qkv = jnp.dot(x.astype(cd), w_qkv.astype(cd),
                  preferred_element_type=jnp.float32) + b_qkv          # (B, T, 3C) f32
    q, k, v = jnp.split(qkv, 3, axis=2)

    def heads(t):                                                      # -> (B, H, T, hd)
        return t.reshape(B, T, n_head, hd).transpose(0, 2, 1, 3).astype(cd)

    q, k, v = heads(q), heads(k), heads(v)
    s = jnp.einsum("bhqd,bhkd->bhqk", q, k,
                   preferred_element_type=jnp.float32) / math.sqrt(hd)
    mask = jnp.tril(jnp.ones((T, T), dtype=bool))
    s = jnp.where(mask[None, None], s, -jnp.inf)
    p = jax.nn.softmax(s, axis=-1)
    y = jnp.einsum("bhqk,bhkd->bhqd", p.astype(cd), v,
                   preferred_element_type=jnp.float32)
    y = y.transpose(0, 2, 1, 3).reshape(B, T, C)
    return jnp.dot(y.astype(cd), w_proj.astype(cd),
                   preferred_element_type=jnp.float32) + b_proj


if __name__ == "__main__":
    # Small config consistent with the module: n_embd=128, n_head=4 -> head_dim=32, batch=2.
    # T=256 with block_q=128 / block_t=128 so the causal tiling (off-diagonal, diagonal and
    # fully-skipped KV tiles) and the multi-tile online softmax are actually exercised while
    # respecting the TPU (8, 128) minor-dim tiling rules.
    B, T, C, n_head = 2, 256, 128, 4

    key = jax.random.PRNGKey(0)
    kx, k1, k2, k3, k4 = jax.random.split(key, 5)

    x = jax.random.normal(kx, (B, T, C), dtype=jnp.float32)
    lim = 1.0 / math.sqrt(C)
    w_qkv = jax.random.uniform(k1, (C, 3 * C), jnp.float32, -lim, lim)
    b_qkv = jax.random.uniform(k2, (3 * C,), jnp.float32, -lim, lim)
    w_proj = jax.random.uniform(k3, (C, C), jnp.float32, -lim, lim)
    b_proj = jax.random.uniform(k4, (C,), jnp.float32, -lim, lim)

    out = causal_self_attention(x, w_qkv, b_qkv, w_proj, b_proj, n_head,
                                block_q=128, block_t=128)
    out = jax.block_until_ready(out)
    assert out.shape == (B, T, C)

    # Tight check: reference with the same bf16 matmul inputs / f32 accumulation.
    ref_mixed = causal_self_attention_ref(x, w_qkv, b_qkv, w_proj, b_proj,
                                          n_head, compute_dtype=jnp.bfloat16)
    err_mixed = float(jnp.max(jnp.abs(out - ref_mixed)))
    assert err_mixed < 5e-2, f"mismatch vs bf16-matched reference: {err_mixed}"

    # Loose sanity check vs the pure-f32 reference (bf16 matmul inputs bound accuracy).
    ref_f32 = causal_self_attention_ref(x, w_qkv, b_qkv, w_proj, b_proj,
                                        n_head, compute_dtype=jnp.float32)
    err_f32 = float(jnp.max(jnp.abs(out - ref_f32)))
    assert err_f32 < 2e-1, f"mismatch vs f32 reference: {err_f32}"

    print("KERNEL_OK")
</pallas_src>

<mosaic_0001>
module attributes {stable_mosaic.version = 11 : i64} {
  func.func @kernel(%arg0: i32, %arg1: i32, %arg2: memref<1x128x128xbf16, #tpu.memory_space<vmem>>, %arg3: memref<128x384xbf16, #tpu.memory_space<vmem>>, %arg4: memref<1x384xf32, #tpu.memory_space<vmem>>, %arg5: memref<1x4x128x32xbf16, #tpu.memory_space<vmem>>, %arg6: memref<1x4x128x32xbf16, #tpu.memory_space<vmem>>, %arg7: memref<1x4x128x32xbf16, #tpu.memory_space<vmem>>) attributes {dimension_semantics = [#tpu.dimension_semantics<parallel>, #tpu.dimension_semantics<parallel>], iteration_bounds = array<i64: 2, 2>, scalar_prefetch = 0 : i64, scratch_operands = 0 : i64, tpu.core_type = #tpu.core_type<tc>, window_params = [{transform_indices = @transform_0, window_bounds = array<i64: 1, 128, 128>}, {pipeline_mode = #tpu.pipeline_mode<synchronous>, transform_indices = @transform_1, window_bounds = array<i64: 128, 384>}, {pipeline_mode = #tpu.pipeline_mode<synchronous>, transform_indices = @transform_2, window_bounds = array<i64: 1, 384>}, {transform_indices = @transform_3, window_bounds = array<i64: 1, 4, 128, 32>}, {transform_indices = @transform_4, window_bounds = array<i64: 1, 4, 128, 32>}, {transform_indices = @transform_5, window_bounds = array<i64: 1, 4, 128, 32>}]} {
    %c0 = arith.constant 0 : index
    %c0_0 = arith.constant 0 : index
    %c0_1 = arith.constant 0 : index
    %0 = vector.load %arg2[%c0, %c0_0, %c0_1] : memref<1x128x128xbf16, #tpu.memory_space<vmem>>, vector<1x128x128xbf16>
    %1 = vector.shape_cast %0 : vector<1x128x128xbf16> to vector<128x128xbf16>
    %c0_2 = arith.constant 0 : index
    %c0_3 = arith.constant 0 : index
    %2 = vector.load %arg3[%c0_2, %c0_3] : memref<128x384xbf16, #tpu.memory_space<vmem>>, vector<128x384xbf16>
    %cst = arith.constant dense<0.000000e+00> : vector<128x384xf32>
    %3 = tpu.matmul %1, %2, %cst {dimension_numbers = #tpu.dot_dimension_numbers<[1], [0], [0], [1], [0, 0, 1, 1], [], []>} : vector<128x128xbf16>, vector<128x384xbf16>, vector<128x384xf32> -> vector<128x384xf32>
    %c0_4 = arith.constant 0 : index
    %c0_5 = arith.constant 0 : index
    %4 = vector.load %arg4[%c0_4, %c0_5] : memref<1x384xf32, #tpu.memory_space<vmem>>, vector<1x384xf32>
    %5 = vector.broadcast %4 : vector<1x384xf32> to vector<128x384xf32>
    %6 = arith.addf %3, %5 : vector<128x384xf32>
    %7 = vector.extract_strided_slice %6 {offsets = [0, 0], sizes = [128, 32], strides = [1, 1]} : vector<128x384xf32> to vector<128x32xf32>
    %8 = arith.truncf %7 : vector<128x32xf32> to vector<128x32xbf16>
    %c0_6 = arith.constant 0 : index
    %c0_7 = arith.constant 0 : index
    %c0_8 = arith.constant 0 : index
    %c0_9 = arith.constant 0 : index
    %9 = vector.load %arg5[%c0_6, %c0_7, %c0_8, %c0_9] : memref<1x4x128x32xbf16, #tpu.memory_space<vmem>>, vector<1x1x128x32xbf16>
    %10 = vector.shape_cast %9 : vector<1x1x128x32xbf16> to vector<128x32xbf16>
    %11 = vector.shape_cast %8 : vector<128x32xbf16> to vector<1x1x128x32xbf16>
    tpu.vector_store %arg5[%c0_6, %c0_7, %c0_8, %c0_9], %11 {strides = array<i32>} : memref<1x4x128x32xbf16, #tpu.memory_space<vmem>>, vector<1x1x128x32xbf16>,
    %12 = vector.extract_strided_slice %6 {offsets = [0, 128], sizes = [128, 32], strides = [1, 1]} : vector<128x384xf32> to vector<128x32xf32>
    %13 = arith.truncf %12 : vector<128x32xf32> to vector<128x32xbf16>
    %c0_10 = arith.constant 0 : index
    %c0_11 = arith.constant 0 : index
    %c0_12 = arith.constant 0 : index
    %c0_13 = arith.constant 0 : index
    %14 = vector.load %arg6[%c0_10, %c0_11, %c0_12, %c0_13] : memref<1x4x128x32xbf16, #tpu.memory_space<vmem>>, vector<1x1x128x32xbf16>
    %15 = vector.shape_cast %14 : vector<1x1x128x32xbf16> to vector<128x32xbf16>
    %16 = vector.shape_cast %13 : vector<128x32xbf16> to vector<1x1x128x32xbf16>
    tpu.vector_store %arg6[%c0_10, %c0_11, %c0_12, %c0_13], %16 {strides = array<i32>} : memref<1x4x128x32xbf16, #tpu.memory_space<vmem>>, vector<1x1x128x32xbf16>,
    %17 = vector.extract_strided_slice %6 {offsets = [0, 256], sizes = [128, 32], strides = [1, 1]} : vector<128x384xf32> to vector<128x32xf32>
    %18 = arith.truncf %17 : vector<128x32xf32> to vector<128x32xbf16>
    %c0_14 = arith.constant 0 : index
    %c0_15 = arith.constant 0 : index
    %c0_16 = arith.constant 0 : index
    %c0_17 = arith.constant 0 : index
    %19 = vector.load %arg7[%c0_14, %c0_15, %c0_16, %c0_17] : memref<1x4x128x32xbf16, #tpu.memory_space<vmem>>, vector<1x1x128x32xbf16>
    %20 = vector.shape_cast %19 : vector<1x1x128x32xbf16> to vector<128x32xbf16>
    %21 = vector.shape_cast %18 : vector<128x32xbf16> to vector<1x1x128x32xbf16>
    tpu.vector_store %arg7[%c0_14, %c0_15, %c0_16, %c0_17], %21 {strides = array<i32>} : memref<1x4x128x32xbf16, #tpu.memory_space<vmem>>, vector<1x1x128x32xbf16>,
    %22 = vector.extract_strided_slice %6 {offsets = [0, 32], sizes = [128, 32], strides = [1, 1]} : vector<128x384xf32> to vector<128x32xf32>
    %23 = arith.truncf %22 : vector<128x32xf32> to vector<128x32xbf16>
    %c0_18 = arith.constant 0 : index
    %c1 = arith.constant 1 : index
    %c0_19 = arith.constant 0 : index
    %c0_20 = arith.constant 0 : index
    %24 = vector.load %arg5[%c0_18, %c1, %c0_19, %c0_20] : memref<1x4x128x32xbf16, #tpu.memory_space<vmem>>, vector<1x1x128x32xbf16>
    %25 = vector.shape_cast %24 : vector<1x1x128x32xbf16> to vector<128x32xbf16>
    %26 = vector.shape_cast %23 : vector<128x32xbf16> to vector<1x1x128x32xbf16>
    tpu.vector_store %arg5[%c0_18, %c1, %c0_19, %c0_20], %26 {strides = array<i32>} : memref<1x4x128x32xbf16, #tpu.memory_space<vmem>>, vector<1x1x128x32xbf16>,
    %27 = vector.extract_strided_slice %6 {offsets = [0, 160], sizes = [128, 32], strides = [1, 1]} : vector<128x384xf32> to vector<128x32xf32>
    %28 = arith.truncf %27 : vector<128x32xf32> to vector<128x32xbf16>
    %c0_21 = arith.constant 0 : index
    %c1_22 = arith.constant 1 : index
    %c0_23 = arith.constant 0 : index
    %c0_24 = arith.constant 0 : index
    %29 = vector.load %arg6[%c0_21, %c1_22, %c0_23, %c0_24] : memref<1x4x128x32xbf16, #tpu.memory_space<vmem>>, vector<1x1x128x32xbf16>
    %30 = vector.shape_cast %29 : vector<1x1x128x32xbf16> to vector<128x32xbf16>
    %31 = vector.shape_cast %28 : vector<128x32xbf16> to vector<1x1x128x32xbf16>
    tpu.vector_store %arg6[%c0_21, %c1_22, %c0_23, %c0_24], %31 {strides = array<i32>} : memref<1x4x128x32xbf16, #tpu.memory_space<vmem>>, vector<1x1x128x32xbf16>,
    %32 = vector.extract_strided_slice %6 {offsets = [0, 288], sizes = [128, 32], strides = [1, 1]} : vector<128x384xf32> to vector<128x32xf32>
    %33 = arith.truncf %32 : vector<128x32xf32> to vector<128x32xbf16>
    %c0_25 = arith.constant 0 : index
    %c1_26 = arith.constant 1 : index
    %c0_27 = arith.constant 0 : index
    %c0_28 = arith.constant 0 : index
    %34 = vector.load %arg7[%c0_25, %c1_26, %c0_27, %c0_28] : memref<1x4x128x32xbf16, #tpu.memory_space<vmem>>, vector<1x1x128x32xbf16>
    %35 = vector.shape_cast %34 : vector<1x1x128x32xbf16> to vector<128x32xbf16>
    %36 = vector.shape_cast %33 : vector<128x32xbf16> to vector<1x1x128x32xbf16>
    tpu.vector_store %arg7[%c0_25, %c1_26, %c0_27, %c0_28], %36 {strides = array<i32>} : memref<1x4x128x32xbf16, #tpu.memory_space<vmem>>, vector<1x1x128x32xbf16>,
    %37 = vector.extract_strided_slice %6 {offsets = [0, 64], sizes = [128, 32], strides = [1, 1]} : vector<128x384xf32> to vector<128x32xf32>
    %38 = arith.truncf %37 : vector<128x32xf32> to vector<128x32xbf16>
    %c0_29 = arith.constant 0 : index
    %c2 = arith.constant 2 : index
    %c0_30 = arith.constant 0 : index
    %c0_31 = arith.constant 0 : index
    %39 = vector.load %arg5[%c0_29, %c2, %c0_30, %c0_31] : memref<1x4x128x32xbf16, #tpu.memory_space<vmem>>, vector<1x1x128x32xbf16>
    %40 = vector.shape_cast %39 : vector<1x1x128x32xbf16> to vector<128x32xbf16>
    %41 = vector.shape_cast %38 : vector<128x32xbf16> to vector<1x1x128x32xbf16>
    tpu.vector_store %arg5[%c0_29, %c2, %c0_30, %c0_31], %41 {strides = array<i32>} : memref<1x4x128x32xbf16, #tpu.memory_space<vmem>>, vector<1x1x128x32xbf16>,
    %42 = vector.extract_strided_slice %6 {offsets = [0, 192], sizes = [128, 32], strides = [1, 1]} : vector<128x384xf32> to vector<128x32xf32>
    %43 = arith.truncf %42 : vector<128x32xf32> to vector<128x32xbf16>
    %c0_32 = arith.constant 0 : index
    %c2_33 = arith.constant 2 : index
    %c0_34 = arith.constant 0 : index
    %c0_35 = arith.constant 0 : index
    %44 = vector.load %arg6[%c0_32, %c2_33, %c0_34, %c0_35] : memref<1x4x128x32xbf16, #tpu.memory_space<vmem>>, vector<1x1x128x32xbf16>
    %45 = vector.shape_cast %44 : vector<1x1x128x32xbf16> to vector<128x32xbf16>
    %46 = vector.shape_cast %43 : vector<128x32xbf16> to vector<1x1x128x32xbf16>
    tpu.vector_store %arg6[%c0_32, %c2_33, %c0_34, %c0_35], %46 {strides = array<i32>} : memref<1x4x128x32xbf16, #tpu.memory_space<vmem>>, vector<1x1x128x32xbf16>,
    %47 = vector.extract_strided_slice %6 {offsets = [0, 320], sizes = [128, 32], strides = [1, 1]} : vector<128x384xf32> to vector<128x32xf32>
    %48 = arith.truncf %47 : vector<128x32xf32> to vector<128x32xbf16>
    %c0_36 = arith.constant 0 : index
    %c2_37 = arith.constant 2 : index
    %c0_38 = arith.constant 0 : index
    %c0_39 = arith.constant 0 : index
    %49 = vector.load %arg7[%c0_36, %c2_37, %c0_38, %c0_39] : memref<1x4x128x32xbf16, #tpu.memory_space<vmem>>, vector<1x1x128x32xbf16>
    %50 = vector.shape_cast %49 : vector<1x1x128x32xbf16> to vector<128x32xbf16>
    %51 = vector.shape_cast %48 : vector<128x32xbf16> to vector<1x1x128x32xbf16>
    tpu.vector_store %arg7[%c0_36, %c2_37, %c0_38, %c0_39], %51 {strides = array<i32>} : memref<1x4x128x32xbf16, #tpu.memory_space<vmem>>, vector<1x1x128x32xbf16>,
    %52 = vector.extract_strided_slice %6 {offsets = [0, 96], sizes = [128, 32], strides = [1, 1]} : vector<128x384xf32> to vector<128x32xf32>
    %53 = arith.truncf %52 : vector<128x32xf32> to vector<128x32xbf16>
    %c0_40 = arith.constant 0 : index
    %c3 = arith.constant 3 : index
    %c0_41 = arith.constant 0 : index
    %c0_42 = arith.constant 0 : index
    %54 = vector.load %arg5[%c0_40, %c3, %c0_41, %c0_42] : memref<1x4x128x32xbf16, #tpu.memory_space<vmem>>, vector<1x1x128x32xbf16>
    %55 = vector.shape_cast %54 : vector<1x1x128x32xbf16> to vector<128x32xbf16>
    %56 = vector.shape_cast %53 : vector<128x32xbf16> to vector<1x1x128x32xbf16>
    tpu.vector_store %arg5[%c0_40, %c3, %c0_41, %c0_42], %56 {strides = array<i32>} : memref<1x4x128x32xbf16, #tpu.memory_space<vmem>>, vector<1x1x128x32xbf16>,
    %57 = vector.extract_strided_slice %6 {offsets = [0, 224], sizes = [128, 32], strides = [1, 1]} : vector<128x384xf32> to vector<128x32xf32>
    %58 = arith.truncf %57 : vector<128x32xf32> to vector<128x32xbf16>
    %c0_43 = arith.constant 0 : index
    %c3_44 = arith.constant 3 : index
    %c0_45 = arith.constant 0 : index
    %c0_46 = arith.constant 0 : index
    %59 = vector.load %arg6[%c0_43, %c3_44, %c0_45, %c0_46] : memref<1x4x128x32xbf16, #tpu.memory_space<vmem>>, vector<1x1x128x32xbf16>
    %60 = vector.shape_cast %59 : vector<1x1x128x32xbf16> to vector<128x32xbf16>
    %61 = vector.shape_cast %58 : vector<128x32xbf16> to vector<1x1x128x32xbf16>
    tpu.vector_store %arg6[%c0_43, %c3_44, %c0_45, %c0_46], %61 {strides = array<i32>} : memref<1x4x128x32xbf16, #tpu.memory_space<vmem>>, vector<1x1x128x32xbf16>,
    %62 = vector.extract_strided_slice %6 {offsets = [0, 352], sizes = [128, 32], strides = [1, 1]} : vector<128x384xf32> to vector<128x32xf32>
    %63 = arith.truncf %62 : vector<128x32xf32> to vector<128x32xbf16>
    %c0_47 = arith.constant 0 : index
    %c3_48 = arith.constant 3 : index
    %c0_49 = arith.constant 0 : index
    %c0_50 = arith.constant 0 : index
    %64 = vector.load %arg7[%c0_47, %c3_48, %c0_49, %c0_50] : memref<1x4x128x32xbf16, #tpu.memory_space<vmem>>, vector<1x1x128x32xbf16>
    %65 = vector.shape_cast %64 : vector<1x1x128x32xbf16> to vector<128x32xbf16>
    %66 = vector.shape_cast %63 : vector<128x32xbf16> to vector<1x1x128x32xbf16>
    tpu.vector_store %arg7[%c0_47, %c3_48, %c0_49, %c0_50], %66 {strides = array<i32>} : memref<1x4x128x32xbf16, #tpu.memory_space<vmem>>, vector<1x1x128x32xbf16>,
    return
  }
  func.func @transform_0(%arg0: i32, %arg1: i32) -> (i32, i32, i32) {
    %c0_i32 = arith.constant 0 : i32
    %c0_i32_0 = arith.constant 0 : i32
    return %arg0, %arg1, %c0_i32 : i32, i32, i32
  }
  func.func @transform_1(%arg0: i32, %arg1: i32) -> (i32, i32) {
    %c0_i32 = arith.constant 0 : i32
    %c0_i32_0 = arith.constant 0 : i32
    %c0_i32_1 = arith.constant 0 : i32
    return %c0_i32, %c0_i32_0 : i32, i32
  }
  func.func @transform_2(%arg0: i32, %arg1: i32) -> (i32, i32) {
    %c0_i32 = arith.constant 0 : i32
    %c0_i32_0 = arith.constant 0 : i32
    %c0_i32_1 = arith.constant 0 : i32
    return %c0_i32, %c0_i32_0 : i32, i32
  }
  func.func @transform_3(%arg0: i32, %arg1: i32) -> (i32, i32, i32, i32) {
    %c0_i32 = arith.constant 0 : i32
    %c0_i32_0 = arith.constant 0 : i32
    %c0_i32_1 = arith.constant 0 : i32
    return %arg0, %c0_i32, %arg1, %c0_i32_0 : i32, i32, i32, i32
  }
  func.func @transform_4(%arg0: i32, %arg1: i32) -> (i32, i32, i32, i32) {
    %c0_i32 = arith.constant 0 : i32
    %c0_i32_0 = arith.constant 0 : i32
    %c0_i32_1 = arith.constant 0 : i32
    return %arg0, %c0_i32, %arg1, %c0_i32_0 : i32, i32, i32, i32
  }
  func.func @transform_5(%arg0: i32, %arg1: i32) -> (i32, i32, i32, i32) {
    %c0_i32 = arith.constant 0 : i32
    %c0_i32_0 = arith.constant 0 : i32
    %c0_i32_1 = arith.constant 0 : i32
    return %arg0, %c0_i32, %arg1, %c0_i32_0 : i32, i32, i32, i32
  }
}

</mosaic_0001>

<bundles_post_ra>
// kernel: tpu_custom_call.1
= control target key start
LH: loop header
LB: loop body
LE: loop exit
PB: predicated region body
PF: predicated region fallthrough
CT: control target
= control target key end

     0   :  { %s4600_s0 = inlined_call_operand.hbm [shape: bf16[2,256,128], index: 0, kind: input, shape index: {}]   ;;  %s4601_s1 = inlined_call_operand.hbm [shape: bf16[128,384], index: 1, kind: input, shape index: {}]   ;;  %s4602_s2 = inlined_call_operand.vmem [shape: f32[1,384], index: 2, kind: input, shape index: {}]   ;;  %s4603_s3 = inlined_call_operand.vmem [shape: bf16[2,4,256,32], index: 3, kind: output, shape index: {0}]   ;;  %s4604_s4 = inlined_call_operand.vmem [shape: bf16[2,4,256,32], index: 4, kind: output, shape index: {1}]   ;;  %s4605_s5 = inlined_call_operand.vmem [shape: bf16[2,4,256,32], index: 5, kind: output, shape index: {2}]  }
   0x1   :  { %4611 = sst [smem:[#allocation12_spill]] %s4601_s1 }
   0x2   :  { %4612 = sst [smem:[#allocation13_spill]] %s4603_s3 }
   0x3   :  { %4613 = sst [smem:[#allocation14_spill]] %s4604_s4 }
   0x4   :  { %4614 = sst [smem:[#allocation15_spill]] %s4605_s5 }
   0x5   :  { %11 = vsyncpa [#allocation3], 0 }
   0x6   :  { %13 = vsyncpa [#allocation3 + $0x1], 0 }
   0x7   :  { %14 = vsyncpa [#allocation5], 0  ;;  %s3280_s18 = smov 0   ;;  %s3282_s19 = smov 0  }
   0x8   :  { %s3284_s20 = smov 0   ;;  %s3286_s21 = smov 0  }
   0x9   :  { %s3288_s22 = smov 0   ;;  %s3290_s23 = smov 0  }
   0xa   :  { %s3292_s24 = smov 0   ;;  %s3294_s25 = smov 0  }
   0xb LB: > { %s2631_s26 = sadd.s32 4294967295, %s3238_s25   ;;  %p54_p0 = scmp.ne.s32.totalorder %s3214_s19, %s3210_s18  ;;  %s3238_s25 = sphi %s3294_s25, %s20_s25   ;;  %s3234_s24 = sphi %s3292_s24, %s4639_s24   ;;  %s3230_s23 = sphi %s3290_s23, %s4638_s23   ;;  %s3226_s22 = sphi %s3288_s22, %s4637_s22   ;;  %s3222_s21 = sphi %s3286_s21, %s4636_s21   ;;  %s3218_s20 = sphi %s3284_s20, %s4635_s20   ;;  %s3214_s19 = sphi %s3282_s19, %s4634_s19   ;;  %s3210_s18 = sphi %s3280_s18, %s4633_s18  }
   0xc   : > { %p3320_p1 = scmp.eq.s32.totalorder %s2631_s26, 0  ;;  %p3324_p2 = scmp.eq.s32.totalorder %s2631_s26, 3 }
   0xd   : > { %p2633_p3 = scmp.ge.s32.totalorder %s3238_s25, 1  ;;  %p191_p4 = scmp.lt.s32.totalorder %s3238_s25, 5 }
   0xe   : > { %s4615_s27 = scalar_select %p3320_p1, 1, 0 }
   0xf   : > { %s4616_s28 = scalar_select %p3324_p2, 1, 0 }
  0x10   : > { %p3332_p5 = por %p3320_p1, %p54_p0  ;;  %p3336_p6 = pnand %p2633_p3, %p191_p4 }
  0x11   : > { %s3240_s6 = smov [#allocation4]   ;;  %s4620_s1 = sld [smem:[#allocation12_spill]] }
  0x12   : > { %s4617_s29 = scalar_select %p3332_p5, 1, 0 }
  0x13   : > { %s4618_s30 = scalar_select %p3336_p6, 1, 0 }
  0x14   : > { %s203_s7 = sshll.u32 %s3240_s6, 4  ;;  %p2986_p7 = pneg %p3336_p6  ;;  %s204_s7 = int_to_ptr.vmem [resolvable:$true] %s203_s7 }
  0x16   : > { %p3344_p8 = pnand %p2986_p7, %p3320_p1 }
  0x17   : > { %s3110_s11 = scalar_lea.hbm %s4620_s1, 3072 }
  0x18   : > { %p3111_p9 = scmp.ne.s32.totalorder %s4620_s1, %s3110_s11  ;;  %p3112_p10 = pneg %p3344_p8 }
  0x19   : > { %p3117_p13 = scmp.lt.u32.totalorder %s3110_s11, %s4620_s1 }
  0x1a   : > { %p3113_p11 = pnand %p3112_p10, %p3111_p9 }
  0x1c   : > { %p3114_p12 = pneg %p3113_p11 }
  0x1e   : > { %p3119_p0 = pnand %p3117_p13, %p3114_p12 }
  0x20   : > { %3122 = shalt.err (!%p3119_p0)
}
  0x21   : > { %s3123_s16 = scalar_lea.vmem %s204_s7, 3072  ;;  %p3131_p1 = scmp.lt.s32.totalorder %s204_s7, %s204_s7 }
  0x22   : > { %p3124_p3 = scmp.ne.s32.totalorder %s204_s7, %s3123_s16  ;;  %p3132_p5 = scmp.lt.s32.totalorder %s3123_s16, %s3123_s16 }
  0x24   : > { %p3126_p4 = pnand %p3124_p3, %p3112_p10  ;;  %p3133_p6 = por %p3132_p5, %p3131_p1 }
  0x26   : > { %p3127_p7 = pneg %p3126_p4 }
  0x28   : > { %p3134_p2 = pnand %p3133_p6, %p3127_p7 }
  0x2a   : > { %3137 = shalt.err (!%p3134_p2)
}
  0x2b   : > { %s3241_s17 = smov 192   ;;  %s3242_s18 = smov 12  }
  0x2c   : > { %2989 = dma.hbm_to_vmem [thread:$0]  (!%p3344_p8), %s4620_s1, 3072, %s204_s7, [#allocation5], %s3241_s17, %s3241_s17, %s3242_s18  }
  0x2d   : > { %s29_s9 = sadd.s32 1, %s3230_s23  ;;  %s32_s10 = sadd.s32 1, %s3234_s24 }
  0x2e   : > { %p30_p1 = scmp.ge.s32.totalorder %s29_s9, 2  ;;  %s41_s11 = sadd.s32 1, %s3218_s20 }
  0x2f   : > { %p48_p2 = scmp.ne.s32.totalorder %s3218_s20, %s3214_s19  ;;  %p49_p5 = scmp.eq.s32.totalorder %s3238_s25, 0 }
  0x30   : > { %s4641_s9 = smov (%p30_p1, %s29_s9), 0  ;;  %s4643_s10 = smov (!%p30_p1, %s32_s10), %s3234_s24 }
  0x31   : > { %4621 = sst [smem:[#allocation11_spill]] %s4641_s9  ;;  %s37_s12 = ssub.s32 %s3230_s23, %s4641_s9 }
  0x32   : > { %p3375_p6 = por %p49_p5, %p48_p2  ;;  %p34_p8 = scmp.ge.s32.totalorder %s4643_s10, 2 }
  0x33   : > { %p4623_p9 = scmp.ne.s32.totalorder %s4616_s28, 0  ;;  %p2995_p11 = scmp.lt.s32.totalorder %s3238_s25, 4 }
  0x34   : > { %s220_s13 = sand.u32 1, %s3218_s20   ;;  %s4645_s10 = smov (%p34_p8, %s4643_s10), 0 }
  0x35   : > { %p3381_p10 = por %p4623_p9, %p48_p2  ;;  %s2636_s14 = sshll.u32 %s220_s13, 6 }
  0x36   : > { %s36_s15 = ssub.s32 %s3234_s24, %s4645_s10  ;;  %s2637_s17 = sshll.u32 %s3230_s23, 4 }
  0x37   : > { %s38_s16 = sor.u32 %s37_s12, %s36_s15  ;;  %s2638_s18 = sshll.u32 %s3234_s24, 5 }
  0x38   : > { %p39_p12 = scmp.eq.s32.totalorder %s38_s16, 0  ;;  %s230_s26 = sadd.s32 %s2638_s18, %s2637_s17 }
  0x39   : > { %s224_s6 = scalar_lea.vmem [#allocation2], %s2636_s14  ;;  %s2639_s9 = sshll.u32 %s230_s26, 6 }
  0x3a   : > { %s233_s28 = sshll.u32 %s224_s6, 4  ;;  %s3401_s3 = scalar_lea.hbm %s4600_s0, %s2639_s9  ;;  %s3396_s28 = int_to_ptr.vmem [resolvable:$true] %s233_s28 }
  0x3b   : > { %s3394_s1 = scalar_select %p39_p12, %s3218_s20, %s41_s11  }
  0x3c   : > { %p3407_p13 = pnand %p2995_p11, %p3375_p6  ;;  %s3411_s11 = scalar_lea.sflag [#allocation3], %s220_s13 }
  0x3d   : > { %s3138_s14 = scalar_lea.hbm %s3401_s3, 1024  ;;  %s3143_s9 = scalar_lea.hbm %s4600_s0, 4096 }
  0x3e   : > { %p3139_p0 = scmp.ne.s32.totalorder %s3401_s3, %s3138_s14  ;;  %p3140_p3 = pneg %p3407_p13 }
  0x3f   : > { %p3144_p1 = scmp.lt.u32.totalorder %s3401_s3, %s4600_s0  ;;  %p3145_p2 = scmp.lt.u32.totalorder %s3143_s9, %s3138_s14 }
  0x40   : > { %p3141_p4 = pnand %p3140_p3, %p3139_p0  ;;  %p3147_p6 = scmp.lt.u32.totalorder %s3138_s14, %s3401_s3 }
  0x41   : > { %p3146_p5 = por %p3145_p2, %p3144_p1 }
  0x42   : > { %p3142_p7 = pneg %p3141_p4 }
  0x43   : > { %p3148_p8 = por %p3147_p6, %p3146_p5 }
  0x45   : > { %p3149_p9 = pnand %p3148_p8, %p3142_p7 }
  0x47   : > { %3152 = shalt.err (!%p3149_p9)
}
  0x48   : > { %s3153_s13 = scalar_lea.vmem %s3396_s28, 1024  ;;  %s3243_s16 = smov [#allocation2]  }
  0x49   : > { %p3154_p11 = scmp.ne.s32.totalorder %s3396_s28, %s3153_s13  ;;  %s3158_s17 = sshll.u32 %s3243_s16, 4  ;;  %s3159_s17 = int_to_ptr.vmem [resolvable:$false] %s3158_s17 }
  0x4a   : > { %s3160_s18 = scalar_lea.vmem %s3159_s17, 2048  ;;  %p3161_p4 = scmp.lt.s32.totalorder %s3396_s28, %s3159_s17 }
  0x4b   : > { %p3156_p12 = pnand %p3154_p11, %p3140_p3  ;;  %p3162_p1 = scmp.lt.s32.totalorder %s3160_s18, %s3153_s13 }
  0x4d   : > { %p3157_p0 = pneg %p3156_p12  ;;  %p3163_p2 = por %p3162_p1, %p3161_p4 }
  0x4f   : > { %p3164_p5 = pnand %p3163_p2, %p3157_p0 }
  0x51   : > { %3167 = shalt.err (!%p3164_p5)
}
  0x52   : > { %s3244_s26 = smov 64   ;;  %s3245_s6 = smov 4  }
  0x53   : > { %2993 = dma.hbm_to_vmem [thread:$0]  (!%p3407_p13), %s3401_s3, 1024, %s3396_s28, %s3411_s11, %s3244_s26, %s3244_s26, %s3245_s6  }
  0x54   : > { %p4626_p3 = scmp.ne.s32.totalorder %s4618_s30, 0 }
  0x55   : > { %s3442_s14 = sand.u32 (!%p4626_p3), 1, %s3214_s19   ;;  %p4627_p7 = scmp.ne.s32.totalorder (!%p4626_p3), %s4617_s29, 0 }
  0x56   : > { %245 = sbr.rel (%p4626_p3) target bundleno = 797 (0x31d), region = 32  ;;  %s2641_s4 = sshll.u32 (!%p4626_p3), %s3442_s14, 6 }
  0x57   : > { %s248_s5 = scalar_lea.sflag (!%p4626_p3), [#allocation3], %s3442_s14  ;;  %s3446_s9 = scalar_lea.vmem (!%p4626_p3), [#allocation2], %s2641_s4 }
  0x5d   : > { %3201 = dma.done.wait (%p4627_p7), %s248_s5, 1024  }
  0x5e   : > { %3203 = vsyncadd (%p4627_p7), %s248_s5, 4294966272  ;;  %p4628_p13 = scmp.ne.s32.totalorder %s4615_s27, 0 }
  0x60   : > { %3205 = dma.done.wait (%p4628_p13), [#allocation5], 3072  }
  0x61   : > { %3207 = vsyncadd (%p4628_p13), [#allocation5], 4294964224  ;;  %v3246_v0 = vmov 0   ;;  %v3070_v1 = vld [vmem:[#allocation4 + $0x4] ss:$12 sps:$4 sm:$0xff]   ;;  %v3103_v26 = vld [vmem:[%s3446_s9 + $0x8] sm:$0xff]   ;;  %v344_v33 = vlaneseq }
  0x62   : > { %567 = vmatprep.mubr.bf16.mxu0 %v3246_v0  ;;  %v3072_v2 = vld [vmem:[#allocation4 + $0x8] ss:$12 sps:$4 sm:$0xff]   ;;  %535 = vmatprep.subr.bf16.mxu0 %v3070_v1  ;;  %v3073_v3 = vld [vmem:[#allocation4] ss:$12 sps:$4 sm:$0xff]   ;;  %v3077_v6 = vld [vmem:[#allocation4 + $0x18] ss:$12 sps:$4 sm:$0xff]  }
  0x63   : > { %2948 = vmatprep.subr.bf16.mxu1 %v3072_v2  ;;  %v3074_v4 = vld [vmem:[#allocation4 + $0x1c] ss:$12 sps:$4 sm:$0xff]   ;;  %536 = vmatpush1.bf16.msra.mxu0 %v3073_v3  ;;  %v3076_v5 = vld [vmem:[#allocation4 + $0x20] ss:$12 sps:$4 sm:$0xff]   ;;  %v3080_v8 = vld [vmem:[#allocation4 + $0x38] ss:$12 sps:$4 sm:$0xff]  }
  0x64   : > { %2949 = vmatpush3.bf16.msra.mxu1 %v3072_v2  ;;  %537 = vmatprep.subr.bf16.mxu0 %v3074_v4  ;;  %v3078_v7 = vld [vmem:[#allocation4 + $0x34] ss:$12 sps:$4 sm:$0xff]   ;;  %v3081_v9 = vld [vmem:[#allocation4 + $0x30] ss:$12 sps:$4 sm:$0xff]   ;;  %v3082_v10 = vld [vmem:[#allocation4 + $0x4c] ss:$12 sps:$4 sm:$0xff]  }
  0x65   : > { %2950 = vmatprep.subr.bf16.mxu1 %v3076_v5  ;;  %v3084_v11 = vld [vmem:[#allocation4 + $0x50] ss:$12 sps:$4 sm:$0xff]   ;;  %v3085_v12 = vld [vmem:[#allocation4 + $0x48] ss:$12 sps:$4 sm:$0xff]   ;;  %v3089_v15 = vld [vmem:[#allocation4 + $0x60] ss:$12 sps:$4 sm:$0xff]  }
  0x66   : > { %v3086_v13 = vld [vmem:[#allocation4 + $0x64] ss:$12 sps:$4 sm:$0xff]   ;;  %v3088_v14 = vld [vmem:[#allocation4 + $0x68] ss:$12 sps:$4 sm:$0xff]   ;;  %v3092_v17 = vld [vmem:[#allocation4 + $0x80] ss:$12 sps:$4 sm:$0xff]  }
  0x67   : > { %538 = vmatpush1.bf16.msra.mxu0 %v3077_v6  ;;  %v3090_v16 = vld [vmem:[#allocation4 + $0x7c] ss:$12 sps:$4 sm:$0xff]   ;;  %v3093_v18 = vld [vmem:[#allocation4 + $0x78] ss:$12 sps:$4 sm:$0xff]   ;;  %v3094_v20 = vld [vmem:[#allocation4 + $0x94] ss:$12 sps:$4 sm:$0xff]  }
  0x68   : > { %2951 = vmatpush3.bf16.msra.mxu1 %v3076_v5  ;;  %539 = vmatprep.subr.bf16.mxu0 %v3078_v7  ;;  %v3102_v19 = vld [vmem:[%s3446_s9] sm:$0xff]   ;;  %v3097_v22 = vld [vmem:[#allocation4 + $0x90] ss:$12 sps:$4 sm:$0xff]   ;;  %v3098_v23 = vld [vmem:[#allocation4 + $0xac] ss:$12 sps:$4 sm:$0xff]   ;;  %v345_v34 = vshrl.u32 %v344_v33, 7 }
  0x69   : > { %2952 = vmatprep.subr.bf16.mxu1 %v3080_v8  ;;  %v3096_v21 = vld [vmem:[#allocation4 + $0x98] ss:$12 sps:$4 sm:$0xff]   ;;  %2964 = vmatprep.mubr.bf16.mxu1 %v3102_v19  ;;  %v3100_v24 = vld [vmem:[#allocation4 + $0xb0] ss:$12 sps:$4 sm:$0xff]   ;;  %v3101_v25 = vld [vmem:[#allocation4 + $0xa8] ss:$12 sps:$4 sm:$0xff]  }
  0x6a   : > { %v3104_v27 = vld [vmem:[%s3446_s9 + $0x10] sm:$0xff]   ;;  %v3105_v28 = vld [vmem:[%s3446_s9 + $0x18] sm:$0xff]   ;;  %v3106_v29 = vld [vmem:[%s3446_s9 + $0x20] sm:$0xff]   ;;  %v346_v35 = vsub.s32 0, %v345_v34  ;;  %v354_v36 = vsub.s32 2, %v345_v34  ;;  %v350_v38 = vsub.s32 1, %v345_v34 }
  0x6b   : > { %540 = vmatpush1.bf16.msra.mxu0 %v3081_v9  ;;  %v3107_v30 = vld [vmem:[%s3446_s9 + $0x28] sm:$0xff]   ;;  %v3108_v31 = vld [vmem:[%s3446_s9 + $0x30] sm:$0xff]   ;;  %v3109_v32 = vld [vmem:[%s3446_s9 + $0x38] sm:$0xff]   ;;  %s3482_s29 = sshll.u32 %s3442_s14, 8  ;;  %vm809_vm0 = vcmask 257024   ;;  %s3247_s12 = smov 96  }
  0x6c   : > { %2953 = vmatpush3.bf16.msra.mxu1 %v3080_v8  ;;  %541 = vmatprep.subr.bf16.mxu0 %v3082_v10  ;;  %v342_v37 = vld [vmem:[%s4602_s2] sm:$0x7]  ;;  %s3501_s30 = scalar_lea.vmem [#allocation6], %s3482_s29  ;;  %s3507_s28 = scalar_lea.vmem [#allocation8], %s3482_s29 }
  0x6d   : > { %2954 = vmatprep.subr.bf16.mxu1 %v3084_v11  ;;  %v3475_v39 = vrot.slane %v342_v37, %v346_v35  ;;  %v3477_v40 = vrot.slane %v342_v37, %v354_v36  ;;  %v3479_v41 = vrot.slane %v342_v37, %v350_v38  ;;  %s3519_s11 = scalar_lea.vmem [#allocation7], %s3482_s29  ;;  %s3248_s8 = smov 64  }
  0x6e   : > { %s3249_s15 = smov 32   ;;  %s2873_s13 = sshll.u32 (%p3381_p10), %s3222_s21, 4 }
  0x6f   : > { %542 = vmatpush1.bf16.msra.mxu0 %v3085_v12  ;;  %s2874_s16 = sshll.u32 (%p3381_p10), %s3226_s22, 7  ;;  %s4629_s14 = sld [smem:[#allocation13_spill]] (%p3381_p10) }
  0x70   : > { %2955 = vmatpush3.bf16.msra.mxu1 %v3084_v11  ;;  %543 = vmatprep.subr.bf16.mxu0 %v3086_v13  ;;  %s1588_s17 = sadd.s32 (%p3381_p10), %s2874_s16, %s2873_s13 }
  0x71   : > { %2956 = vmatprep.subr.bf16.mxu1 %v3088_v14  ;;  %s2875_s18 = sshll.u32 (%p3381_p10), %s1588_s17, 2 }
  0x73   : > { %544 = vmatpush1.bf16.msra.mxu0 %v3089_v15 }
  0x74   : > { %2957 = vmatpush3.bf16.msra.mxu1 %v3088_v14  ;;  %545 = vmatprep.subr.bf16.mxu0 %v3090_v16 }
  0x75   : > { %2958 = vmatprep.subr.bf16.mxu1 %v3092_v17  ;;  %s4373_s4 = scalar_lea.vmem (%p3381_p10), %s4629_s14, %s2875_s18 }
  0x77   : > { %546 = vmatpush1.bf16.msra.mxu0 %v3093_v18 }
  0x78   : > { %2959 = vmatpush3.bf16.msra.mxu1 %v3092_v17  ;;  %547 = vmatprep.subr.bf16.mxu0 %v3094_v20 }
  0x79   : > { %2960 = vmatprep.subr.bf16.mxu1 %v3096_v21 }
  0x7b   : > { %548 = vmatpush1.bf16.msra.mxu0 %v3097_v22 }
  0x7c   : > { %2961 = vmatpush3.bf16.msra.mxu1 %v3096_v21  ;;  %549 = vmatprep.subr.bf16.mxu0 %v3098_v23 }
  0x7d   : > { %2962 = vmatprep.subr.bf16.mxu1 %v3100_v24 }
  0x7f   : > { %550 = vmatpush1.bf16.msra.mxu0 %v3101_v25 }
  0x80   : > { %2963 = vmatpush3.bf16.msra.mxu1 %v3100_v24 }
  0x82   : > { %568 = vmatmul.mubr.bf16.vlgmr.msra.gmra.mrb[0].mxu0 %v3102_v19 }
  0x83   : > { %2965 = vmatmul.mubr.bf16.vlgmr.msra.gmra.mrb[0].mxu1 %v3103_v26  ;;  %577 = vmatprep.mubr.bf16.mxu0 %v3246_v0 }
  0x84   : > { %2968 = vmatprep.mubr.bf16.mxu1 %v3104_v27 }
  0x8a   : > { %578 = vmatmul.mubr.bf16.gmra.mrb[4].mxu0 %v3103_v26 }
  0x8b   : > { %2969 = vmatmul.mubr.bf16.gmra.mrb[4].mxu1 %v3105_v28  ;;  %587 = vmatprep.mubr.bf16.mxu0 %v3246_v0 }
  0x8c   : > { %2972 = vmatprep.mubr.bf16.mxu1 %v3106_v29 }
  0x92   : > { %588 = vmatmul.mubr.bf16.gmra.mrb[8].mxu0 %v3104_v27 }
  0x93   : > { %2973 = vmatmul.mubr.bf16.gmra.mrb[8].mxu1 %v3107_v30  ;;  %597 = vmatprep.mubr.bf16.mxu0 %v3246_v0 }
  0x94   : > { %2976 = vmatprep.mubr.bf16.mxu1 %v3108_v31 }
  0x9a   : > { %598 = vmatmul.mubr.bf16.gmra.mrb[12].mxu0 %v3105_v28 }
  0x9b   : > { %2977 = vmatmul.mubr.bf16.gmra.mrb[12].mxu1 %v3109_v32  ;;  %607 = vmatprep.mubr.bf16.mxu0 %v3246_v0 }
  0xa2   : > { %608 = vmatmul.mubr.bf16.gmra.mrb[16].mxu0 %v3106_v29 }
  0xa3   : > { %617 = vmatprep.mubr.bf16.mxu0 %v3246_v0 }
  0xaa   : > { %618 = vmatmul.mubr.bf16.gmra.mrb[20].mxu0 %v3107_v30 }
  0xab   : > { %627 = vmatprep.mubr.bf16.mxu0 %v3246_v0 }
  0xb2   : > { %628 = vmatmul.mubr.bf16.gmra.mrb[24].mxu0 %v3108_v31 }
  0xb3   : > { %637 = vmatprep.mubr.bf16.mxu0 %v3246_v0 }
  0xba   : > { %638 = vmatmul.mubr.bf16.gmra.mrb[28].mxu0 %v3109_v32 }
 0x155   : > { %v569_v42 = vpop.f32.mrb[0].mxu0 }
 0x156   : > { %v2966_v43 = vpop.f32.mrb[0].mxu1  ;;  %v570_v44 = vadd.f32 %v569_v42, %v3475_v39  ;;  %v571_v46 = vpop.f32.mrb[1].mxu0 }
 0x157   : > { %v691_v45 = vadd.f32 %v2966_v43, %v3477_v40  ;;  %v682_v47 = vpop.f32.mrb[1].mxu1  ;;  %v572_v48 = vadd.f32 %v571_v46, %v3479_v41  ;;  %v573_v50 = vpop.f32.mrb[2].mxu0 }
 0x158   : > { %v683_v49 = vadd.f32 %v682_v47, %v3477_v40  ;;  %v2967_v51 = vpop.f32.mrb[2].mxu1  ;;  %v3488_v52 = vpack.c.bf16 %v570_v44, %v570_v44  ;;  %v574_v54 = vadd.f32 %v573_v50, %v3475_v39  ;;  %v575_v56 = vpop.f32.mrb[3].mxu0 }
 0x159   : > { %v3490_v53 = vpack.c.bf16 %v691_v45, %v691_v45  ;;  %v694_v55 = vadd.f32 %v2967_v51, %v3477_v40  ;;  %v685_v57 = vpop.f32.mrb[3].mxu1  ;;  %v3494_v58 = vpack.c.bf16 %v572_v48, %v572_v48  ;;  %v576_v60 = vadd.f32 %v575_v56, %v3479_v41 }
 0x15a   : > { %v3496_v59 = vpack.c.bf16 %v683_v49, %v683_v49  ;;  %v686_v61 = vadd.f32 %v685_v57, %v3477_v40  ;;  %810 = vst.msk [vmem:[%s3501_s30] sm:$0xf] %vm809_vm0, %v3488_v52  ;;  %v3512_v62 = vpack.c.bf16 %v574_v54, %v574_v54  ;;  %986 = vrot.lane.b32.xlu0 %v3488_v52, %s3247_s12 }
 0x15b   : > { %972 = vst.msk [vmem:[%s3507_s28 + $0x8] sm:$0xf] %vm809_vm0, %v3490_v53  ;;  %v3514_v63 = vpack.c.bf16 %v694_v55, %v694_v55  ;;  %890 = vst.msk [vmem:[%s3519_s11] sm:$0xf] %vm809_vm0, %v3494_v58  ;;  %v3527_v0 = vpack.c.bf16 %v576_v60, %v576_v60 }
 0x15c   : > { %970 = vst.msk [vmem:[%s3507_s28] sm:$0xf] %vm809_vm0, %v3496_v59  ;;  %v3529_v1 = vpack.c.bf16 %v686_v61, %v686_v61  ;;  %811 = vst.msk [vmem:[%s3501_s30 + $0x4] sm:$0xf] %vm809_vm0, %v3512_v62 }
 0x15d   : > { %973 = vst.msk [vmem:[%s3507_s28 + $0xc] sm:$0xf] %vm809_vm0, %v3514_v63  ;;  %1122 = vrot.lane.b32.xlu1 %v3514_v63, %s3247_s12  ;;  %891 = vst.msk [vmem:[%s3519_s11 + $0x4] sm:$0xf] %vm809_vm0, %v3527_v0  ;;  %v579_v2 = vpop.f32.mrb[4].mxu0 }
 0x15e   : > { %971 = vst.msk [vmem:[%s3507_s28 + $0x4] sm:$0xf] %vm809_vm0, %v3529_v1  ;;  %v2970_v3 = vpop.f32.mrb[4].mxu1  ;;  %1120 = vrot.lane.b32.xlu0 %v3490_v53, %s3247_s12  ;;  %v580_v4 = vadd.f32 %v579_v2, %v3475_v39  ;;  %v581_v5 = vpop.f32.mrb[5].mxu0 }
 0x15f   : > { %v707_v6 = vadd.f32 %v2970_v3, %v3477_v40  ;;  %v698_v7 = vpop.f32.mrb[5].mxu1  ;;  %v582_v8 = vadd.f32 %v581_v5, %v3479_v41  ;;  %v583_v9 = vpop.f32.mrb[6].mxu0 }
 0x160   : > { %v699_v10 = vadd.f32 %v698_v7, %v3477_v40  ;;  %v2971_v11 = vpop.f32.mrb[6].mxu1  ;;  %v3553_v12 = vpack.c.bf16 %v580_v4, %v580_v4  ;;  %v584_v13 = vadd.f32 %v583_v9, %v3475_v39  ;;  %v585_v14 = vpop.f32.mrb[7].mxu0 }
 0x161   : > { %1183 = vrot.lane.b32.xlu1 %v3512_v62, %s3248_s8  ;;  %v3556_v15 = vpack.c.bf16 %v707_v6, %v707_v6  ;;  %v710_v16 = vadd.f32 %v2971_v11, %v3477_v40  ;;  %v701_v17 = vpop.f32.mrb[7].mxu1  ;;  %v3559_v18 = vpack.c.bf16 %v582_v8, %v582_v8  ;;  %v586_v19 = vadd.f32 %v585_v14, %v3479_v41 }
 0x162   : > { %v3562_v20 = vpack.c.bf16 %v699_v10, %v699_v10  ;;  %v702_v21 = vadd.f32 %v701_v17, %v3477_v40  ;;  %1181 = vrot.lane.b32.xlu0 %v3488_v52, %s3248_s8  ;;  %812 = vst.msk [vmem:[%s3501_s30 + $0x8] sm:$0xf] %vm809_vm0, %v3553_v12  ;;  %v3570_v22 = vpack.c.bf16 %v584_v13, %v584_v13 }
 0x163   : > { %976 = vst.msk [vmem:[%s3507_s28 + $0x18] sm:$0xf] %vm809_vm0, %v3556_v15  ;;  %v3575_v23 = vpack.c.bf16 %v710_v16, %v710_v16  ;;  %892 = vst.msk [vmem:[%s3519_s11 + $0x8] sm:$0xf] %vm809_vm0, %v3559_v18  ;;  %v3580_v24 = vpack.c.bf16 %v586_v19, %v586_v19 }
 0x164   : > { %974 = vst.msk [vmem:[%s3507_s28 + $0x10] sm:$0xf] %vm809_vm0, %v3562_v20  ;;  %v3585_v25 = vpack.c.bf16 %v702_v21, %v702_v21  ;;  %813 = vst.msk [vmem:[%s3501_s30 + $0xc] sm:$0xf] %vm809_vm0, %v3570_v22 }
 0x165   : > { %1317 = vrot.lane.b32.xlu1 %v3514_v63, %s3248_s8  ;;  %977 = vst.msk [vmem:[%s3507_s28 + $0x1c] sm:$0xf] %vm809_vm0, %v3575_v23  ;;  %893 = vst.msk [vmem:[%s3519_s11 + $0xc] sm:$0xf] %vm809_vm0, %v3580_v24  ;;  %v589_v26 = vpop.f32.mrb[8].mxu0 }
 0x166   : > { %975 = vst.msk [vmem:[%s3507_s28 + $0x14] sm:$0xf] %vm809_vm0, %v3585_v25  ;;  %v2974_v27 = vpop.f32.mrb[8].mxu1  ;;  %1315 = vrot.lane.b32.xlu0 %v3490_v53, %s3248_s8  ;;  %v590_v28 = vadd.f32 %v589_v26, %v3475_v39  ;;  %v591_v29 = vpop.f32.mrb[9].mxu0 }
 0x167   : > { %v723_v30 = vadd.f32 %v2974_v27, %v3477_v40  ;;  %v714_v31 = vpop.f32.mrb[9].mxu1  ;;  %v592_v32 = vadd.f32 %v591_v29, %v3479_v41  ;;  %v593_v33 = vpop.f32.mrb[10].mxu0 }
 0x168   : > { %v715_v34 = vadd.f32 %v714_v31, %v3477_v40  ;;  %v2975_v35 = vpop.f32.mrb[10].mxu1  ;;  %v3609_v36 = vpack.c.bf16 %v590_v28, %v590_v28  ;;  %v594_v37 = vadd.f32 %v593_v33, %v3475_v39  ;;  %v595_v38 = vpop.f32.mrb[11].mxu0 }
 0x169   : > { %1378 = vrot.lane.b32.xlu1 %v3512_v62, %s3249_s15  ;;  %v3612_v42 = vpack.c.bf16 %v723_v30, %v723_v30  ;;  %v726_v43 = vadd.f32 %v2975_v35, %v3477_v40  ;;  %v717_v44 = vpop.f32.mrb[11].mxu1  ;;  %v3615_v45 = vpack.c.bf16 %v592_v32, %v592_v32  ;;  %v596_v46 = vadd.f32 %v595_v38, %v3479_v41 }
 0x16a   : > { %v3618_v47 = vpack.c.bf16 %v715_v34, %v715_v34  ;;  %v718_v48 = vadd.f32 %v717_v44, %v3477_v40  ;;  %1376 = vrot.lane.b32.xlu0 %v3488_v52, %s3249_s15  ;;  %814 = vst.msk [vmem:[%s3501_s30 + $0x10] sm:$0xf] %vm809_vm0, %v3609_v36  ;;  %v3626_v49 = vpack.c.bf16 %v594_v37, %v594_v37 }
 0x16b   : > { %980 = vst.msk [vmem:[%s3507_s28 + $0x28] sm:$0xf] %vm809_vm0, %v3612_v42  ;;  %v3631_v50 = vpack.c.bf16 %v726_v43, %v726_v43  ;;  %894 = vst.msk [vmem:[%s3519_s11 + $0x10] sm:$0xf] %vm809_vm0, %v3615_v45  ;;  %v3636_v51 = vpack.c.bf16 %v596_v46, %v596_v46 }
 0x16c   : > { %978 = vst.msk [vmem:[%s3507_s28 + $0x20] sm:$0xf] %vm809_vm0, %v3618_v47  ;;  %v3641_v54 = vpack.c.bf16 %v718_v48, %v718_v48  ;;  %815 = vst.msk [vmem:[%s3501_s30 + $0x14] sm:$0xf] %vm809_vm0, %v3626_v49 }
 0x16d   : > { %1512 = vrot.lane.b32.xlu1 %v3514_v63, %s3249_s15  ;;  %981 = vst.msk [vmem:[%s3507_s28 + $0x2c] sm:$0xf] %vm809_vm0, %v3631_v50  ;;  %895 = vst.msk [vmem:[%s3519_s11 + $0x14] sm:$0xf] %vm809_vm0, %v3636_v51  ;;  %v599_v52 = vpop.f32.mrb[12].mxu0 }
 0x16e   : > { %979 = vst.msk [vmem:[%s3507_s28 + $0x24] sm:$0xf] %vm809_vm0, %v3641_v54  ;;  %v2978_v55 = vpop.f32.mrb[12].mxu1  ;;  %1510 = vrot.lane.b32.xlu0 %v3490_v53, %s3249_s15  ;;  %v600_v56 = vadd.f32 %v599_v52, %v3475_v39  ;;  %v601_v57 = vpop.f32.mrb[13].mxu0 }
 0x16f   : > { %v739_v60 = vadd.f32 %v2978_v55, %v3477_v40  ;;  %v730_v61 = vpop.f32.mrb[13].mxu1  ;;  %v602_v63 = vadd.f32 %v601_v57, %v3479_v41  ;;  %v603_v2 = vpop.f32.mrb[14].mxu0 }
 0x170   : > { %v731_v3 = vadd.f32 %v730_v61, %v3477_v40  ;;  %v2979_v4 = vpop.f32.mrb[14].mxu1  ;;  %v3665_v5 = vpack.c.bf16 %v600_v56, %v600_v56  ;;  %v604_v53 = vadd.f32 %v603_v2, %v3475_v39  ;;  %v605_v6 = vpop.f32.mrb[15].mxu0 }
 0x171   : > { %1053 = vrot.lane.b32.xlu1 %v3527_v0, %s3247_s12  ;;  %v3668_v7 = vpack.c.bf16 %v739_v60, %v739_v60  ;;  %v742_v8 = vadd.f32 %v2979_v4, %v3477_v40  ;;  %v733_v9 = vpop.f32.mrb[15].mxu1  ;;  %v3671_v10 = vpack.c.bf16 %v602_v63, %v602_v63  ;;  %v606_v11 = vadd.f32 %v605_v6, %v3479_v41 }
 0x172   : > { %v3674_v13 = vpack.c.bf16 %v731_v3, %v731_v3  ;;  %v734_v14 = vadd.f32 %v733_v9, %v3477_v40  ;;  %1051 = vrot.lane.b32.xlu0 %v3494_v58, %s3247_s12  ;;  %816 = vst.msk [vmem:[%s3501_s30 + $0x18] sm:$0xf] %vm809_vm0, %v3665_v5  ;;  %v3682_v16 = vpack.c.bf16 %v604_v53, %v604_v53 }
 0x173   : > { %984 = vst.msk [vmem:[%s3507_s28 + $0x38] sm:$0xf] %vm809_vm0, %v3668_v7  ;;  %v3687_v17 = vpack.c.bf16 %v742_v8, %v742_v8  ;;  %896 = vst.msk [vmem:[%s3519_s11 + $0x18] sm:$0xf] %vm809_vm0, %v3671_v10  ;;  %v3692_v19 = vpack.c.bf16 %v606_v11, %v606_v11 }
 0x174   : > { %982 = vst.msk [vmem:[%s3507_s28 + $0x30] sm:$0xf] %vm809_vm0, %v3674_v13  ;;  %v3697_v40 = vpack.c.bf16 %v734_v14, %v734_v14  ;;  %817 = vst.msk [vmem:[%s3501_s30 + $0x1c] sm:$0xf] %vm809_vm0, %v3682_v16 }
 0x175   : > { %1118 = vrot.lane.b32.xlu1 %v3529_v1, %s3247_s12  ;;  %985 = vst.msk [vmem:[%s3507_s28 + $0x3c] sm:$0xf] %vm809_vm0, %v3687_v17  ;;  %897 = vst.msk [vmem:[%s3519_s11 + $0x1c] sm:$0xf] %vm809_vm0, %v3692_v19 }
 0x176   : > { %983 = vst.msk [vmem:[%s3507_s28 + $0x34] sm:$0xf] %vm809_vm0, %v3697_v40  ;;  %1116 = vrot.lane.b32.xlu0 %v3496_v59, %s3247_s12 }
 0x179   : > { %1248 = vrot.lane.b32.xlu1 %v3527_v0, %s3248_s8 }
 0x17a   : > { %1246 = vrot.lane.b32.xlu0 %v3494_v58, %s3248_s8 }
 0x17d   : > { %1313 = vrot.lane.b32.xlu1 %v3529_v1, %s3248_s8 }
 0x17e   : > { %1311 = vrot.lane.b32.xlu0 %v3496_v59, %s3248_s8 }
 0x181   : > { %1443 = vrot.lane.b32.xlu1 %v3527_v0, %s3249_s15  ;;  %v609_v0 = vpop.f32.mrb[16].mxu0 }
 0x182   : > { %1441 = vrot.lane.b32.xlu0 %v3494_v58, %s3249_s15  ;;  %v610_v58 = vadd.f32 %v609_v0, %v3475_v39 }
 0x185   : > { %1508 = vrot.lane.b32.xlu1 %v3529_v1, %s3249_s15  ;;  %v611_v1 = vpop.f32.mrb[17].mxu0 }
 0x186   : > { %1506 = vrot.lane.b32.xlu0 %v3496_v59, %s3249_s15  ;;  %v3742_v59 = vpack.c.bf16 %v610_v58, %v610_v58  ;;  %v613_v21 = vpop.f32.mrb[18].mxu0 }
 0x187   : > { %v614_v26 = vadd.f32 %v613_v21, %v3475_v39  ;;  %v615_v27 = vpop.f32.mrb[19].mxu0 }
 0x188   : > { %818 = vst.msk [vmem:[%s3501_s30 + $0x20] sm:$0xf] %vm809_vm0, %v3742_v59  ;;  %v616_v29 = vadd.f32 %v615_v27, %v3479_v41  ;;  %v619_v32 = vpop.f32.mrb[20].mxu0 }
 0x189   : > { %990 = vrot.lane.b32.xlu1 %v3553_v12, %s3247_s12  ;;  %v3754_v30 = vpack.c.bf16 %v614_v26, %v614_v26 }
 0x18a   : > { %988 = vrot.lane.b32.xlu0 %v3512_v62, %s3247_s12  ;;  %v612_v62 = vadd.f32 %v611_v1, %v3479_v41  ;;  %v3761_v31 = vpack.c.bf16 %v616_v29, %v616_v29 }
 0x18b   : > { %819 = vst.msk [vmem:[%s3501_s30 + $0x24] sm:$0xf] %vm809_vm0, %v3754_v30 }
 0x18c   : > { %v3751_v28 = vpack.c.bf16 %v612_v62, %v612_v62  ;;  %899 = vst.msk [vmem:[%s3519_s11 + $0x24] sm:$0xf] %vm809_vm0, %v3761_v31 }
 0x18d   : > { %992 = vrot.lane.b32.xlu1 %v3570_v22, %s3247_s12 }
 0x18e   : > { %1128 = vrot.lane.b32.xlu0 %v3556_v15, %s3247_s12  ;;  %898 = vst.msk [vmem:[%s3519_s11 + $0x20] sm:$0xf] %vm809_vm0, %v3751_v28 }
 0x191   : > { %1130 = vrot.lane.b32.xlu1 %v3575_v23, %s3247_s12 }
 0x192   : > { %1185 = vrot.lane.b32.xlu0 %v3553_v12, %s3248_s8 }
 0x195   : > { %1187 = vrot.lane.b32.xlu1 %v3570_v22, %s3248_s8 }
 0x196   : > { %1323 = vrot.lane.b32.xlu0 %v3556_v15, %s3248_s8 }
 0x199   : > { %1325 = vrot.lane.b32.xlu1 %v3575_v23, %s3248_s8 }
 0x19a   : > { %1380 = vrot.lane.b32.xlu0 %v3553_v12, %s3249_s15  ;;  %v620_v12 = vadd.f32 %v619_v32, %v3475_v39 }
 0x19d   : > { %1382 = vrot.lane.b32.xlu1 %v3570_v22, %s3249_s15  ;;  %v621_v22 = vpop.f32.mrb[21].mxu0 }
 0x19e   : > { %1518 = vrot.lane.b32.xlu0 %v3556_v15, %s3249_s15  ;;  %v3790_v15 = vpack.c.bf16 %v620_v12, %v620_v12  ;;  %v623_v33 = vpop.f32.mrb[22].mxu0 }
 0x19f   : > { %v624_v34 = vadd.f32 %v623_v33, %v3475_v39  ;;  %v625_v35 = vpop.f32.mrb[23].mxu0 }
 0x1a0   : > { %820 = vst.msk [vmem:[%s3501_s30 + $0x28] sm:$0xf] %vm809_vm0, %v3790_v15  ;;  %v626_v38 = vadd.f32 %v625_v35, %v3479_v41  ;;  %v629_v46 = vpop.f32.mrb[24].mxu0 }
 0x1a1   : > { %1520 = vrot.lane.b32.xlu1 %v3575_v23, %s3249_s15  ;;  %v622_v23 = vadd.f32 %v621_v22, %v3479_v41  ;;  %v3802_v43 = vpack.c.bf16 %v624_v34, %v624_v34 }
 0x1a2   : > { %1055 = vrot.lane.b32.xlu0 %v3559_v18, %s3247_s12  ;;  %v3809_v44 = vpack.c.bf16 %v626_v38, %v626_v38 }
 0x1a3   : > { %v3799_v37 = vpack.c.bf16 %v622_v23, %v622_v23  ;;  %821 = vst.msk [vmem:[%s3501_s30 + $0x2c] sm:$0xf] %vm809_vm0, %v3802_v43 }
 0x1a4   : > { %901 = vst.msk [vmem:[%s3519_s11 + $0x2c] sm:$0xf] %vm809_vm0, %v3809_v44 }
 0x1a5   : > { %1057 = vrot.lane.b32.xlu1 %v3580_v24, %s3247_s12  ;;  %900 = vst.msk [vmem:[%s3519_s11 + $0x28] sm:$0xf] %vm809_vm0, %v3799_v37 }
 0x1a6   : > { %1124 = vrot.lane.b32.xlu0 %v3562_v20, %s3247_s12 }
 0x1a9   : > { %1126 = vrot.lane.b32.xlu1 %v3585_v25, %s3247_s12 }
 0x1aa   : > { %1250 = vrot.lane.b32.xlu0 %v3559_v18, %s3248_s8 }
 0x1ad   : > { %1252 = vrot.lane.b32.xlu1 %v3580_v24, %s3248_s8 }
 0x1ae   : > { %1319 = vrot.lane.b32.xlu0 %v3562_v20, %s3248_s8 }
 0x1b1   : > { %1321 = vrot.lane.b32.xlu1 %v3585_v25, %s3248_s8 }
 0x1b2   : > { %1445 = vrot.lane.b32.xlu0 %v3559_v18, %s3249_s15  ;;  %v630_v18 = vadd.f32 %v629_v46, %v3475_v39 }
 0x1b5   : > { %1447 = vrot.lane.b32.xlu1 %v3580_v24, %s3249_s15  ;;  %v631_v24 = vpop.f32.mrb[25].mxu0 }
 0x1b6   : > { %1514 = vrot.lane.b32.xlu0 %v3562_v20, %s3249_s15  ;;  %v3838_v20 = vpack.c.bf16 %v630_v18, %v630_v18  ;;  %v633_v48 = vpop.f32.mrb[26].mxu0 }
 0x1b7   : > { %v634_v52 = vadd.f32 %v633_v48, %v3475_v39  ;;  %v635_v55 = vpop.f32.mrb[27].mxu0 }
 0x1b8   : > { %822 = vst.msk [vmem:[%s3501_s30 + $0x30] sm:$0xf] %vm809_vm0, %v3838_v20  ;;  %v636_v57 = vadd.f32 %v635_v55, %v3479_v41 }
 0x1b9   : > { %1516 = vrot.lane.b32.xlu1 %v3585_v25, %s3249_s15  ;;  %v632_v25 = vadd.f32 %v631_v24, %v3479_v41  ;;  %v3850_v60 = vpack.c.bf16 %v634_v52, %v634_v52 }
 0x1ba   : > { %994 = vrot.lane.b32.xlu0 %v3609_v36, %s3247_s12  ;;  %v3857_v61 = vpack.c.bf16 %v636_v57, %v636_v57 }
 0x1bb   : > { %v3847_v56 = vpack.c.bf16 %v632_v25, %v632_v25  ;;  %823 = vst.msk [vmem:[%s3501_s30 + $0x34] sm:$0xf] %vm809_vm0, %v3850_v60 }
 0x1bc   : > { %903 = vst.msk [vmem:[%s3519_s11 + $0x34] sm:$0xf] %vm809_vm0, %v3857_v61 }
 0x1bd   : > { %996 = vrot.lane.b32.xlu1 %v3626_v49, %s3247_s12  ;;  %902 = vst.msk [vmem:[%s3519_s11 + $0x30] sm:$0xf] %vm809_vm0, %v3847_v56 }
 0x1be   : > { %1136 = vrot.lane.b32.xlu0 %v3612_v42, %s3247_s12 }
 0x1c1   : > { %1138 = vrot.lane.b32.xlu1 %v3631_v50, %s3247_s12 }
 0x1c2   : > { %1189 = vrot.lane.b32.xlu0 %v3609_v36, %s3248_s8 }
 0x1c5   : > { %1191 = vrot.lane.b32.xlu1 %v3626_v49, %s3248_s8 }
 0x1c6   : > { %1331 = vrot.lane.b32.xlu0 %v3612_v42, %s3248_s8 }
 0x1c9   : > { %1333 = vrot.lane.b32.xlu1 %v3631_v50, %s3248_s8 }
 0x1ca   : > { %1384 = vrot.lane.b32.xlu0 %v3609_v36, %s3249_s15 }
 0x1cc   : > { %v987_v63 = vpop.permute.xlu0 %986 }
 0x1cd   : > { %1386 = vrot.lane.b32.xlu1 %v3626_v49, %s3249_s15  ;;  %2726 = vst.msk [vmem:[%s3501_s30 + $0x40] sm:$0xf] %vm809_vm0, %v987_v63 }
 0x1ce   : > { %1526 = vrot.lane.b32.xlu0 %v3612_v42, %s3249_s15  ;;  %v639_v42 = vpop.f32.mrb[28].mxu0 }
 0x1cf   : > { %v1123_v2 = vpop.permute.xlu1 %1122  ;;  %v641_v53 = vpop.f32.mrb[29].mxu0 }
 0x1d0   : > { %2761 = vst.msk [vmem:[%s3507_s28 + $0x4c] sm:$0xf] %vm809_vm0, %v1123_v2  ;;  %v1121_v3 = vpop.permute.xlu0 %1120  ;;  %v642_v9 = vadd.f32 %v641_v53, %v3479_v41  ;;  %v643_v11 = vpop.f32.mrb[30].mxu0 }
 0x1d1   : > { %1528 = vrot.lane.b32.xlu1 %v3631_v50, %s3249_s15  ;;  %2760 = vst.msk [vmem:[%s3507_s28 + $0x48] sm:$0xf] %vm809_vm0, %v1121_v3  ;;  %v640_v50 = vadd.f32 %v639_v42, %v3475_v39  ;;  %v644_v14 = vadd.f32 %v643_v11, %v3475_v39  ;;  %v645_v0 = vpop.f32.mrb[31].mxu0 }
 0x1d2   : > { %1059 = vrot.lane.b32.xlu0 %v3615_v45, %s3247_s12  ;;  %v3909_v1 = vpack.c.bf16 %v642_v9, %v642_v9  ;;  %v646_v62 = vadd.f32 %v645_v0, %v3479_v41 }
 0x1d3   : > { %v1184_v36 = vpop.permute.xlu1 %1183  ;;  %v3898_v8 = vpack.c.bf16 %v640_v50, %v640_v50  ;;  %v3914_v21 = vpack.c.bf16 %v644_v14, %v644_v14 }
 0x1d4   : > { %2775 = vst.msk [vmem:[%s3501_s30 + $0x84] sm:$0xf] %vm809_vm0, %v1184_v36  ;;  %v1182_v49 = vpop.permute.xlu0 %1181  ;;  %904 = vst.msk [vmem:[%s3519_s11 + $0x38] sm:$0xf] %vm809_vm0, %v3909_v1  ;;  %v3921_v26 = vpack.c.bf16 %v646_v62, %v646_v62 }
 0x1d5   : > { %1061 = vrot.lane.b32.xlu1 %v3636_v51, %s3247_s12  ;;  %2774 = vst.msk [vmem:[%s3501_s30 + $0x80] sm:$0xf] %vm809_vm0, %v1182_v49  ;;  %824 = vst.msk [vmem:[%s3501_s30 + $0x38] sm:$0xf] %vm809_vm0, %v3898_v8 }
 0x1d6   : > { %1132 = vrot.lane.b32.xlu0 %v3618_v47, %s3247_s12  ;;  %825 = vst.msk [vmem:[%s3501_s30 + $0x3c] sm:$0xf] %vm809_vm0, %v3914_v21  ;;  %905 = vst.msk [vmem:[%s3519_s11 + $0x3c] sm:$0xf] %vm809_vm0, %v3921_v26 }
 0x1d7   : > { %v1318_v4 = vpop.permute.xlu1 %1317 }
 0x1d8   : > { %2809 = vst.msk [vmem:[%s3507_s28 + $0x8c] sm:$0xf] %vm809_vm0, %v1318_v4  ;;  %v1316_v6 = vpop.permute.xlu0 %1315 }
 0x1d9   : > { %1134 = vrot.lane.b32.xlu1 %v3641_v54, %s3247_s12  ;;  %2808 = vst.msk [vmem:[%s3507_s28 + $0x88] sm:$0xf] %vm809_vm0, %v1316_v6 }
 0x1da   : > { %1254 = vrot.lane.b32.xlu0 %v3615_v45, %s3248_s8 }
 0x1db   : > { %v1379_v58 = vpop.permute.xlu1 %1378 }
 0x1dc   : > { %2823 = vst.msk [vmem:[%s3501_s30 + $0xc4] sm:$0xf] %vm809_vm0, %v1379_v58  ;;  %v1377_v39 = vpop.permute.xlu0 %1376 }
 0x1dd   : > { %1256 = vrot.lane.b32.xlu1 %v3636_v51, %s3248_s8  ;;  %2822 = vst.msk [vmem:[%s3501_s30 + $0xc0] sm:$0xf] %vm809_vm0, %v1377_v39 }
 0x1de   : > { %1327 = vrot.lane.b32.xlu0 %v3618_v47, %s3248_s8 }
 0x1df   : > { %v1513_v41 = vpop.permute.xlu1 %1512 }
 0x1e0   : > { %2857 = vst.msk [vmem:[%s3507_s28 + $0xcc] sm:$0xf] %vm809_vm0, %v1513_v41  ;;  %v1511_v27 = vpop.permute.xlu0 %1510 }
 0x1e1   : > { %1329 = vrot.lane.b32.xlu1 %v3641_v54, %s3248_s8  ;;  %2856 = vst.msk [vmem:[%s3507_s28 + $0xc8] sm:$0xf] %vm809_vm0, %v1511_v27 }
 0x1e2   : > { %1449 = vrot.lane.b32.xlu0 %v3615_v45, %s3249_s15 }
 0x1e3   : > { %v1054_v29 = vpop.permute.xlu1 %1053 }
 0x1e4   : > { %2743 = vst.msk [vmem:[%s3519_s11 + $0x44] sm:$0xf] %vm809_vm0, %v1054_v29  ;;  %v1052_v32 = vpop.permute.xlu0 %1051 }
 0x1e5   : > { %1451 = vrot.lane.b32.xlu1 %v3636_v51, %s3249_s15  ;;  %2742 = vst.msk [vmem:[%s3519_s11 + $0x40] sm:$0xf] %vm809_vm0, %v1052_v32 }
 0x1e6   : > { %1522 = vrot.lane.b32.xlu0 %v3618_v47, %s3249_s15 }
 0x1e7   : > { %v1119_v12 = vpop.permute.xlu1 %1118 }
 0x1e8   : > { %2759 = vst.msk [vmem:[%s3507_s28 + $0x44] sm:$0xf] %vm809_vm0, %v1119_v12  ;;  %v1117_v45 = vpop.permute.xlu0 %1116 }
 0x1e9   : > { %1524 = vrot.lane.b32.xlu1 %v3641_v54, %s3249_s15  ;;  %2758 = vst.msk [vmem:[%s3507_s28 + $0x40] sm:$0xf] %vm809_vm0, %v1117_v45 }
 0x1ea   : > { %998 = vrot.lane.b32.xlu0 %v3665_v5, %s3247_s12 }
 0x1eb   : > { %v1249_v22 = vpop.permute.xlu1 %1248 }
 0x1ec   : > { %2791 = vst.msk [vmem:[%s3519_s11 + $0x84] sm:$0xf] %vm809_vm0, %v1249_v22  ;;  %v1247_v47 = vpop.permute.xlu0 %1246 }
 0x1ed   : > { %1000 = vrot.lane.b32.xlu1 %v3682_v16, %s3247_s12  ;;  %2790 = vst.msk [vmem:[%s3519_s11 + $0x80] sm:$0xf] %vm809_vm0, %v1247_v47 }
 0x1ee   : > { %1144 = vrot.lane.b32.xlu0 %v3668_v7, %s3247_s12 }
 0x1ef   : > { %v1314_v51 = vpop.permute.xlu1 %1313 }
 0x1f0   : > { %2807 = vst.msk [vmem:[%s3507_s28 + $0x84] sm:$0xf] %vm809_vm0, %v1314_v51  ;;  %v1312_v54 = vpop.permute.xlu0 %1311 }
 0x1f1   : > { %1146 = vrot.lane.b32.xlu1 %v3687_v17, %s3247_s12  ;;  %2806 = vst.msk [vmem:[%s3507_s28 + $0x80] sm:$0xf] %vm809_vm0, %v1312_v54 }
 0x1f2   : > { %1193 = vrot.lane.b32.xlu0 %v3665_v5, %s3248_s8 }
 0x1f3   : > { %v1444_v23 = vpop.permute.xlu1 %1443 }
 0x1f4   : > { %2839 = vst.msk [vmem:[%s3519_s11 + $0xc4] sm:$0xf] %vm809_vm0, %v1444_v23  ;;  %v1442_v33 = vpop.permute.xlu0 %1441 }
 0x1f5   : > { %1195 = vrot.lane.b32.xlu1 %v3682_v16, %s3248_s8  ;;  %2838 = vst.msk [vmem:[%s3519_s11 + $0xc0] sm:$0xf] %vm809_vm0, %v1442_v33 }
 0x1f6   : > { %1339 = vrot.lane.b32.xlu0 %v3668_v7, %s3248_s8 }
 0x1f7   : > { %v1509_v34 = vpop.permute.xlu1 %1508 }
 0x1f8   : > { %2855 = vst.msk [vmem:[%s3507_s28 + $0xc4] sm:$0xf] %vm809_vm0, %v1509_v34  ;;  %v1507_v35 = vpop.permute.xlu0 %1506 }
 0x1f9   : > { %1341 = vrot.lane.b32.xlu1 %v3687_v17, %s3248_s8  ;;  %2854 = vst.msk [vmem:[%s3507_s28 + $0xc0] sm:$0xf] %vm809_vm0, %v1507_v35 }
 0x1fa   : > { %1388 = vrot.lane.b32.xlu0 %v3665_v5, %s3249_s15 }
 0x1fb   : > { %v991_v38 = vpop.permute.xlu1 %990 }
 0x1fc   : > { %2728 = vst.msk [vmem:[%s3501_s30 + $0x48] sm:$0xf] %vm809_vm0, %v991_v38  ;;  %v989_v46 = vpop.permute.xlu0 %988 }
 0x1fd   : > { %1390 = vrot.lane.b32.xlu1 %v3682_v16, %s3249_s15  ;;  %2727 = vst.msk [vmem:[%s3501_s30 + $0x44] sm:$0xf] %vm809_vm0, %v989_v46 }
 0x1fe   : > { %1063 = vrot.lane.b32.xlu0 %v3671_v10, %s3247_s12 }
 0x1ff   : > { %v993_v18 = vpop.permute.xlu1 %992 }
 0x200   : > { %2729 = vst.msk [vmem:[%s3501_s30 + $0x4c] sm:$0xf] %vm809_vm0, %v993_v18  ;;  %v1129_v5 = vpop.permute.xlu0 %1128 }
 0x201   : > { %1065 = vrot.lane.b32.xlu1 %v3692_v19, %s3247_s12  ;;  %2764 = vst.msk [vmem:[%s3507_s28 + $0x58] sm:$0xf] %vm809_vm0, %v1129_v5 }
 0x202   : > { %1140 = vrot.lane.b32.xlu0 %v3674_v13, %s3247_s12 }
 0x203   : > { %v1131_v24 = vpop.permute.xlu1 %1130 }
 0x204   : > { %2765 = vst.msk [vmem:[%s3507_s28 + $0x5c] sm:$0xf] %vm809_vm0, %v1131_v24  ;;  %v1186_v16 = vpop.permute.xlu0 %1185 }
 0x205   : > { %1142 = vrot.lane.b32.xlu1 %v3697_v40, %s3247_s12  ;;  %2776 = vst.msk [vmem:[%s3501_s30 + $0x88] sm:$0xf] %vm809_vm0, %v1186_v16 }
 0x206   : > { %1258 = vrot.lane.b32.xlu0 %v3671_v10, %s3248_s8 }
 0x207   : > { %v1188_v25 = vpop.permute.xlu1 %1187 }
 0x208   : > { %2777 = vst.msk [vmem:[%s3501_s30 + $0x8c] sm:$0xf] %vm809_vm0, %v1188_v25  ;;  %v1324_v48 = vpop.permute.xlu0 %1323 }
 0x209   : > { %1260 = vrot.lane.b32.xlu1 %v3692_v19, %s3248_s8  ;;  %2812 = vst.msk [vmem:[%s3507_s28 + $0x98] sm:$0xf] %vm809_vm0, %v1324_v48 }
 0x20a   : > { %1335 = vrot.lane.b32.xlu0 %v3674_v13, %s3248_s8 }
 0x20b   : > { %v1326_v52 = vpop.permute.xlu1 %1325 }
 0x20c   : > { %2813 = vst.msk [vmem:[%s3507_s28 + $0x9c] sm:$0xf] %vm809_vm0, %v1326_v52  ;;  %v1381_v55 = vpop.permute.xlu0 %1380 }
 0x20d   : > { %1337 = vrot.lane.b32.xlu1 %v3697_v40, %s3248_s8  ;;  %2824 = vst.msk [vmem:[%s3501_s30 + $0xc8] sm:$0xf] %vm809_vm0, %v1381_v55 }
 0x20e   : > { %1453 = vrot.lane.b32.xlu0 %v3671_v10, %s3249_s15 }
 0x20f   : > { %v1383_v57 = vpop.permute.xlu1 %1382 }
 0x210   : > { %2825 = vst.msk [vmem:[%s3501_s30 + $0xcc] sm:$0xf] %vm809_vm0, %v1383_v57  ;;  %v1519_v63 = vpop.permute.xlu0 %1518 }
 0x211   : > { %1455 = vrot.lane.b32.xlu1 %v3692_v19, %s3249_s15  ;;  %2860 = vst.msk [vmem:[%s3507_s28 + $0xd8] sm:$0xf] %vm809_vm0, %v1519_v63 }
 0x212   : > { %1530 = vrot.lane.b32.xlu0 %v3674_v13, %s3249_s15 }
 0x213   : > { %v1521_v2 = vpop.permute.xlu1 %1520 }
 0x214   : > { %2861 = vst.msk [vmem:[%s3507_s28 + $0xdc] sm:$0xf] %vm809_vm0, %v1521_v2  ;;  %v1056_v10 = vpop.permute.xlu0 %1055 }
 0x215   : > { %1532 = vrot.lane.b32.xlu1 %v3697_v40, %s3249_s15  ;;  %2744 = vst.msk [vmem:[%s3519_s11 + $0x48] sm:$0xf] %vm809_vm0, %v1056_v10 }
 0x216   : > { %1002 = vrot.lane.b32.xlu0 %v3742_v59, %s3247_s12 }
 0x217   : > { %v1058_v3 = vpop.permute.xlu1 %1057 }
 0x218   : > { %2745 = vst.msk [vmem:[%s3519_s11 + $0x4c] sm:$0xf] %vm809_vm0, %v1058_v3  ;;  %v1125_v13 = vpop.permute.xlu0 %1124 }
 0x219   : > { %1004 = vrot.lane.b32.xlu1 %v3754_v30, %s3247_s12  ;;  %2762 = vst.msk [vmem:[%s3507_s28 + $0x50] sm:$0xf] %vm809_vm0, %v1125_v13 }
 0x21a   : > { %1197 = vrot.lane.b32.xlu0 %v3742_v59, %s3248_s8 }
 0x21b   : > { %v1127_v19 = vpop.permute.xlu1 %1126 }
 0x21c   : > { %2763 = vst.msk [vmem:[%s3507_s28 + $0x54] sm:$0xf] %vm809_vm0, %v1127_v19  ;;  %v1251_v40 = vpop.permute.xlu0 %1250 }
 0x21d   : > { %1199 = vrot.lane.b32.xlu1 %v3754_v30, %s3248_s8  ;;  %2792 = vst.msk [vmem:[%s3519_s11 + $0x88] sm:$0xf] %vm809_vm0, %v1251_v40 }
 0x21e   : > { %1392 = vrot.lane.b32.xlu0 %v3742_v59, %s3249_s15 }
 0x21f   : > { %v1253_v36 = vpop.permute.xlu1 %1252 }
 0x220   : > { %2793 = vst.msk [vmem:[%s3519_s11 + $0x8c] sm:$0xf] %vm809_vm0, %v1253_v36  ;;  %v1320_v49 = vpop.permute.xlu0 %1319 }
 0x221   : > { %1394 = vrot.lane.b32.xlu1 %v3754_v30, %s3249_s15  ;;  %2810 = vst.msk [vmem:[%s3507_s28 + $0x90] sm:$0xf] %vm809_vm0, %v1320_v49 }
 0x222   : > { %1067 = vrot.lane.b32.xlu0 %v3751_v28, %s3247_s12 }
 0x223   : > { %v1322_v42 = vpop.permute.xlu1 %1321 }
 0x224   : > { %2811 = vst.msk [vmem:[%s3507_s28 + $0x94] sm:$0xf] %vm809_vm0, %v1322_v42  ;;  %v1446_v59 = vpop.permute.xlu0 %1445 }
 0x225   : > { %1069 = vrot.lane.b32.xlu1 %v3761_v31, %s3247_s12  ;;  %2840 = vst.msk [vmem:[%s3519_s11 + $0xc8] sm:$0xf] %vm809_vm0, %v1446_v59 }
 0x226   : > { %1262 = vrot.lane.b32.xlu0 %v3751_v28, %s3248_s8 }
 0x227   : > { %v1448_v4 = vpop.permute.xlu1 %1447 }
 0x228   : > { %2841 = vst.msk [vmem:[%s3519_s11 + $0xcc] sm:$0xf] %vm809_vm0, %v1448_v4  ;;  %v1515_v30 = vpop.permute.xlu0 %1514 }
 0x229   : > { %1264 = vrot.lane.b32.xlu1 %v3761_v31, %s3248_s8  ;;  %2858 = vst.msk [vmem:[%s3507_s28 + $0xd0] sm:$0xf] %vm809_vm0, %v1515_v30 }
 0x22a   : > { %1457 = vrot.lane.b32.xlu0 %v3751_v28, %s3249_s15 }
 0x22b   : > { %v1517_v50 = vpop.permute.xlu1 %1516 }
 0x22c   : > { %2859 = vst.msk [vmem:[%s3507_s28 + $0xd4] sm:$0xf] %vm809_vm0, %v1517_v50  ;;  %v995_v53 = vpop.permute.xlu0 %994 }
 0x22d   : > { %1459 = vrot.lane.b32.xlu1 %v3761_v31, %s3249_s15  ;;  %2730 = vst.msk [vmem:[%s3501_s30 + $0x50] sm:$0xf] %vm809_vm0, %v995_v53 }
 0x22e   : > { %1006 = vrot.lane.b32.xlu0 %v3790_v15, %s3247_s12 }
 0x22f   : > { %v997_v6 = vpop.permute.xlu1 %996 }
 0x230   : > { %2731 = vst.msk [vmem:[%s3501_s30 + $0x54] sm:$0xf] %vm809_vm0, %v997_v6  ;;  %v1137_v28 = vpop.permute.xlu0 %1136 }
 0x231   : > { %1008 = vrot.lane.b32.xlu1 %v3802_v43, %s3247_s12  ;;  %2768 = vst.msk [vmem:[%s3507_s28 + $0x68] sm:$0xf] %vm809_vm0, %v1137_v28 }
 0x232   : > { %1201 = vrot.lane.b32.xlu0 %v3790_v15, %s3248_s8 }
 0x233   : > { %v1139_v9 = vpop.permute.xlu1 %1138 }
 0x234   : > { %2769 = vst.msk [vmem:[%s3507_s28 + $0x6c] sm:$0xf] %vm809_vm0, %v1139_v9  ;;  %v1190_v31 = vpop.permute.xlu0 %1189 }
 0x235   : > { %1203 = vrot.lane.b32.xlu1 %v3802_v43, %s3248_s8  ;;  %2778 = vst.msk [vmem:[%s3501_s30 + $0x90] sm:$0xf] %vm809_vm0, %v1190_v31 }
 0x236   : > { %1396 = vrot.lane.b32.xlu0 %v3790_v15, %s3249_s15 }
 0x237   : > { %v1192_v11 = vpop.permute.xlu1 %1191 }
 0x238   : > { %2779 = vst.msk [vmem:[%s3501_s30 + $0x94] sm:$0xf] %vm809_vm0, %v1192_v11  ;;  %v1332_v14 = vpop.permute.xlu0 %1331 }
 0x239   : > { %1398 = vrot.lane.b32.xlu1 %v3802_v43, %s3249_s15  ;;  %2816 = vst.msk [vmem:[%s3507_s28 + $0xa8] sm:$0xf] %vm809_vm0, %v1332_v14 }
 0x23a   : > { %1071 = vrot.lane.b32.xlu0 %v3799_v37, %s3247_s12 }
 0x23b   : > { %v1334_v0 = vpop.permute.xlu1 %1333 }
 0x23c   : > { %2817 = vst.msk [vmem:[%s3507_s28 + $0xac] sm:$0xf] %vm809_vm0, %v1334_v0  ;;  %v1385_v15 = vpop.permute.xlu0 %1384 }
 0x23d   : > { %1073 = vrot.lane.b32.xlu1 %v3809_v44, %s3247_s12  ;;  %2826 = vst.msk [vmem:[%s3501_s30 + $0xd0] sm:$0xf] %vm809_vm0, %v1385_v15 }
 0x23e   : > { %1266 = vrot.lane.b32.xlu0 %v3799_v37, %s3248_s8 }
 0x23f   : > { %v1387_v58 = vpop.permute.xlu1 %1386 }
 0x240   : > { %2827 = vst.msk [vmem:[%s3501_s30 + $0xd4] sm:$0xf] %vm809_vm0, %v1387_v58  ;;  %v1527_v43 = vpop.permute.xlu0 %1526 }
 0x241   : > { %1268 = vrot.lane.b32.xlu1 %v3809_v44, %s3248_s8  ;;  %2864 = vst.msk [vmem:[%s3507_s28 + $0xe8] sm:$0xf] %vm809_vm0, %v1527_v43 }
 0x242   : > { %1461 = vrot.lane.b32.xlu0 %v3799_v37, %s3249_s15 }
 0x243   : > { %v1529_v62 = vpop.permute.xlu1 %1528 }
 0x244   : > { %2865 = vst.msk [vmem:[%s3507_s28 + $0xec] sm:$0xf] %vm809_vm0, %v1529_v62  ;;  %v1060_v39 = vpop.permute.xlu0 %1059 }
 0x245   : > { %1463 = vrot.lane.b32.xlu1 %v3809_v44, %s3249_s15  ;;  %2746 = vst.msk [vmem:[%s3519_s11 + $0x50] sm:$0xf] %vm809_vm0, %v1060_v39 }
 0x246   : > { %1010 = vrot.lane.b32.xlu0 %v3838_v20, %s3247_s12 }
 0x247   : > { %v1062_v41 = vpop.permute.xlu1 %1061 }
 0x248   : > { %2747 = vst.msk [vmem:[%s3519_s11 + $0x54] sm:$0xf] %vm809_vm0, %v1062_v41  ;;  %v1133_v37 = vpop.permute.xlu0 %1132 }
 0x249   : > { %1012 = vrot.lane.b32.xlu1 %v3850_v60, %s3247_s12  ;;  %2766 = vst.msk [vmem:[%s3507_s28 + $0x60] sm:$0xf] %vm809_vm0, %v1133_v37 }
 0x24a   : > { %1205 = vrot.lane.b32.xlu0 %v3838_v20, %s3248_s8 }
 0x24b   : > { %v1135_v27 = vpop.permute.xlu1 %1134 }
 0x24c   : > { %2767 = vst.msk [vmem:[%s3507_s28 + $0x64] sm:$0xf] %vm809_vm0, %v1135_v27  ;;  %v1255_v44 = vpop.permute.xlu0 %1254 }
 0x24d   : > { %1207 = vrot.lane.b32.xlu1 %v3850_v60, %s3248_s8  ;;  %2794 = vst.msk [vmem:[%s3519_s11 + $0x90] sm:$0xf] %vm809_vm0, %v1255_v44 }
 0x24e   : > { %1400 = vrot.lane.b32.xlu0 %v3838_v20, %s3249_s15 }
 0x24f   : > { %v1257_v29 = vpop.permute.xlu1 %1256 }
 0x250   : > { %2795 = vst.msk [vmem:[%s3519_s11 + $0x94] sm:$0xf] %vm809_vm0, %v1257_v29  ;;  %v1328_v32 = vpop.permute.xlu0 %1327 }
 0x251   : > { %1402 = vrot.lane.b32.xlu1 %v3850_v60, %s3249_s15  ;;  %2814 = vst.msk [vmem:[%s3507_s28 + $0xa0] sm:$0xf] %vm809_vm0, %v1328_v32 }
 0x252   : > { %1075 = vrot.lane.b32.xlu0 %v3847_v56, %s3247_s12 }
 0x253   : > { %v1330_v12 = vpop.permute.xlu1 %1329 }
 0x254   : > { %2815 = vst.msk [vmem:[%s3507_s28 + $0xa4] sm:$0xf] %vm809_vm0, %v1330_v12  ;;  %v1450_v20 = vpop.permute.xlu0 %1449 }
 0x255   : > { %1077 = vrot.lane.b32.xlu1 %v3857_v61, %s3247_s12  ;;  %2842 = vst.msk [vmem:[%s3519_s11 + $0xd0] sm:$0xf] %vm809_vm0, %v1450_v20 }
 0x256   : > { %1270 = vrot.lane.b32.xlu0 %v3847_v56, %s3248_s8 }
 0x257   : > { %v1452_v45 = vpop.permute.xlu1 %1451 }
 0x258   : > { %2843 = vst.msk [vmem:[%s3519_s11 + $0xd4] sm:$0xf] %vm809_vm0, %v1452_v45  ;;  %v1523_v60 = vpop.permute.xlu0 %1522 }
 0x259   : > { %1272 = vrot.lane.b32.xlu1 %v3857_v61, %s3248_s8  ;;  %2862 = vst.msk [vmem:[%s3507_s28 + $0xe0] sm:$0xf] %vm809_vm0, %v1523_v60 }
 0x25a   : > { %1465 = vrot.lane.b32.xlu0 %v3847_v56, %s3249_s15 }
 0x25b   : > { %v1525_v22 = vpop.permute.xlu1 %1524 }
 0x25c   : > { %2863 = vst.msk [vmem:[%s3507_s28 + $0xe4] sm:$0xf] %vm809_vm0, %v1525_v22  ;;  %v999_v47 = vpop.permute.xlu0 %998 }
 0x25d   : > { %1467 = vrot.lane.b32.xlu1 %v3857_v61, %s3249_s15  ;;  %2732 = vst.msk [vmem:[%s3501_s30 + $0x58] sm:$0xf] %vm809_vm0, %v999_v47 }
 0x25e   : > { %1014 = vrot.lane.b32.xlu0 %v3898_v8, %s3247_s12 }
 0x25f   : > { %v1001_v51 = vpop.permute.xlu1 %1000 }
 0x260   : > { %2733 = vst.msk [vmem:[%s3501_s30 + $0x5c] sm:$0xf] %vm809_vm0, %v1001_v51  ;;  %v1145_v56 = vpop.permute.xlu0 %1144 }
 0x261   : > { %1016 = vrot.lane.b32.xlu1 %v3914_v21, %s3247_s12  ;;  %2772 = vst.msk [vmem:[%s3507_s28 + $0x78] sm:$0xf] %vm809_vm0, %v1145_v56 }
 0x262   : > { %1209 = vrot.lane.b32.xlu0 %v3898_v8, %s3248_s8 }
 0x263   : > { %v1147_v54 = vpop.permute.xlu1 %1146 }
 0x264   : > { %2773 = vst.msk [vmem:[%s3507_s28 + $0x7c] sm:$0xf] %vm809_vm0, %v1147_v54  ;;  %v1194_v61 = vpop.permute.xlu0 %1193 }
 0x265   : > { %1211 = vrot.lane.b32.xlu1 %v3914_v21, %s3248_s8  ;;  %2780 = vst.msk [vmem:[%s3501_s30 + $0x98] sm:$0xf] %vm809_vm0, %v1194_v61 }
 0x266   : > { %1404 = vrot.lane.b32.xlu0 %v3898_v8, %s3249_s15 }
 0x267   : > { %v1196_v23 = vpop.permute.xlu1 %1195 }
 0x268   : > { %2781 = vst.msk [vmem:[%s3501_s30 + $0x9c] sm:$0xf] %vm809_vm0, %v1196_v23  ;;  %v1340_v33 = vpop.permute.xlu0 %1339 }
 0x269   : > { %1406 = vrot.lane.b32.xlu1 %v3914_v21, %s3249_s15  ;;  %2820 = vst.msk [vmem:[%s3507_s28 + $0xb8] sm:$0xf] %vm809_vm0, %v1340_v33 }
 0x26a   : > { %1079 = vrot.lane.b32.xlu0 %v3909_v1, %s3247_s12 }
 0x26b   : > { %v1342_v34 = vpop.permute.xlu1 %1341 }
 0x26c   : > { %2821 = vst.msk [vmem:[%s3507_s28 + $0xbc] sm:$0xf] %vm809_vm0, %v1342_v34  ;;  %v1389_v8 = vpop.permute.xlu0 %1388 }
 0x26d   : > { %1081 = vrot.lane.b32.xlu1 %v3921_v26, %s3247_s12  ;;  %2828 = vst.msk [vmem:[%s3501_s30 + $0xd8] sm:$0xf] %vm809_vm0, %v1389_v8  ;;  %v1606_v8 = vld [vmem:[%s3501_s30] sm:$0xff] (%p3381_p10)  }
 0x26e   : > { %1274 = vrot.lane.b32.xlu0 %v3909_v1, %s3248_s8  ;;  %1607 = vst [vmem:[%s4373_s4] sm:$0xff] (%p3381_p10), %v1606_v8  }
 0x26f   : > { %v1391_v35 = vpop.permute.xlu1 %1390 }
 0x270   : > { %2829 = vst.msk [vmem:[%s3501_s30 + $0xdc] sm:$0xf] %vm809_vm0, %v1391_v35  ;;  %v1064_v21 = vpop.permute.xlu0 %1063  ;;  %v1610_v35 = vld [vmem:[%s3501_s30 + $0x8] sm:$0xff] (%p3381_p10)  }
 0x271   : > { %1276 = vrot.lane.b32.xlu1 %v3921_v26, %s3248_s8  ;;  %2748 = vst.msk [vmem:[%s3519_s11 + $0x58] sm:$0xf] %vm809_vm0, %v1064_v21  ;;  %v1614_v21 = vld [vmem:[%s3501_s30 + $0x10] sm:$0xff] (%p3381_p10)   ;;  %1611 = vst [vmem:[%s4373_s4 + $0x8] sm:$0xff] (%p3381_p10), %v1610_v35  }
 0x272   : > { %1469 = vrot.lane.b32.xlu0 %v3909_v1, %s3249_s15  ;;  %1615 = vst [vmem:[%s4373_s4 + $0x10] sm:$0xff] (%p3381_p10), %v1614_v21  }
 0x273   : > { %v1066_v38 = vpop.permute.xlu1 %1065 }
 0x274   : > { %2749 = vst.msk [vmem:[%s3519_s11 + $0x5c] sm:$0xf] %vm809_vm0, %v1066_v38  ;;  %v1141_v46 = vpop.permute.xlu0 %1140  ;;  %v1618_v38 = vld [vmem:[%s3501_s30 + $0x18] sm:$0xff] (%p3381_p10)  }
 0x275   : > { %1471 = vrot.lane.b32.xlu1 %v3921_v26, %s3249_s15  ;;  %2770 = vst.msk [vmem:[%s3507_s28 + $0x70] sm:$0xf] %vm809_vm0, %v1141_v46  ;;  %v1622_v46 = vld [vmem:[%s3501_s30 + $0x20] sm:$0xff] (%p3381_p10)   ;;  %1619 = vst [vmem:[%s4373_s4 + $0x18] sm:$0xff] (%p3381_p10), %v1618_v38  }
 0x276   : > { %1534 = vrot.lane.b32.xlu0 %v3668_v7, %s3249_s15  ;;  %1623 = vst [vmem:[%s4373_s4 + $0x20] sm:$0xff] (%p3381_p10), %v1622_v46  }
 0x277   : > { %v1143_v18 = vpop.permute.xlu1 %1142 }
 0x278   : > { %2771 = vst.msk [vmem:[%s3507_s28 + $0x74] sm:$0xf] %vm809_vm0, %v1143_v18  ;;  %v1259_v1 = vpop.permute.xlu0 %1258  ;;  %v1626_v18 = vld [vmem:[%s3501_s30 + $0x28] sm:$0xff] (%p3381_p10)  }
 0x279   : > { %1536 = vrot.lane.b32.xlu1 %v3687_v17, %s3249_s15  ;;  %2796 = vst.msk [vmem:[%s3519_s11 + $0x98] sm:$0xf] %vm809_vm0, %v1259_v1  ;;  %v1630_v1 = vld [vmem:[%s3501_s30 + $0x30] sm:$0xff] (%p3381_p10)   ;;  %1627 = vst [vmem:[%s4373_s4 + $0x28] sm:$0xff] (%p3381_p10), %v1626_v18  }
 0x27a   : > { %1631 = vst [vmem:[%s4373_s4 + $0x30] sm:$0xff] (%p3381_p10), %v1630_v1  }
 0x27b   : > { %v1261_v26 = vpop.permute.xlu1 %1260 }
 0x27c   : > { %2797 = vst.msk [vmem:[%s3519_s11 + $0x9c] sm:$0xf] %vm809_vm0, %v1261_v26  ;;  %v1336_v5 = vpop.permute.xlu0 %1335  ;;  %v1634_v26 = vld [vmem:[%s3501_s30 + $0x38] sm:$0xff] (%p3381_p10)  }
 0x27d   : > { %2818 = vst.msk [vmem:[%s3507_s28 + $0xb0] sm:$0xf] %vm809_vm0, %v1336_v5  ;;  %v1638_v5 = vld [vmem:[%s3501_s30 + $0x40] sm:$0xff] (%p3381_p10)   ;;  %1635 = vst [vmem:[%s4373_s4 + $0x38] sm:$0xff] (%p3381_p10), %v1634_v26  }
 0x27e   : > { %1639 = vst [vmem:[%s4373_s4 + $0x80] sm:$0xff] (%p3381_p10), %v1638_v5  }
 0x27f   : > { %v1338_v7 = vpop.permute.xlu1 %1337 }
 0x280   : > { %2819 = vst.msk [vmem:[%s3507_s28 + $0xb4] sm:$0xf] %vm809_vm0, %v1338_v7  ;;  %v1454_v24 = vpop.permute.xlu0 %1453  ;;  %v1642_v7 = vld [vmem:[%s3501_s30 + $0x48] sm:$0xff] (%p3381_p10)  }
 0x281   : > { %2844 = vst.msk [vmem:[%s3519_s11 + $0xd8] sm:$0xf] %vm809_vm0, %v1454_v24  ;;  %v1646_v24 = vld [vmem:[%s3501_s30 + $0x50] sm:$0xff] (%p3381_p10)   ;;  %1643 = vst [vmem:[%s4373_s4 + $0x88] sm:$0xff] (%p3381_p10), %v1642_v7  }
 0x282   : > { %1647 = vst [vmem:[%s4373_s4 + $0x90] sm:$0xff] (%p3381_p10), %v1646_v24  }
 0x283   : > { %v1456_v17 = vpop.permute.xlu1 %1455 }
 0x284   : > { %2845 = vst.msk [vmem:[%s3519_s11 + $0xdc] sm:$0xf] %vm809_vm0, %v1456_v17  ;;  %v1531_v16 = vpop.permute.xlu0 %1530  ;;  %v1650_v17 = vld [vmem:[%s3501_s30 + $0x58] sm:$0xff] (%p3381_p10)  }
 0x285   : > { %2866 = vst.msk [vmem:[%s3507_s28 + $0xf0] sm:$0xf] %vm809_vm0, %v1531_v16  ;;  %1651 = vst [vmem:[%s4373_s4 + $0x98] sm:$0xff] (%p3381_p10), %v1650_v17  }
 0x287   : > { %v1533_v25 = vpop.permute.xlu1 %1532 }
 0x288   : > { %2867 = vst.msk [vmem:[%s3507_s28 + $0xf4] sm:$0xf] %vm809_vm0, %v1533_v25  ;;  %v1003_v48 = vpop.permute.xlu0 %1002 }
 0x289   : > { %2734 = vst.msk [vmem:[%s3501_s30 + $0x60] sm:$0xf] %vm809_vm0, %v1003_v48 }
 0x28b   : > { %v1005_v52 = vpop.permute.xlu1 %1004 }
 0x28c   : > { %2735 = vst.msk [vmem:[%s3501_s30 + $0x64] sm:$0xf] %vm809_vm0, %v1005_v52  ;;  %v1198_v55 = vpop.permute.xlu0 %1197 }
 0x28d   : > { %2782 = vst.msk [vmem:[%s3501_s30 + $0xa0] sm:$0xf] %vm809_vm0, %v1198_v55  ;;  %v1670_v55 = vld [vmem:[%s3501_s30 + $0x80] sm:$0xff] (%p3381_p10)  }
 0x28e   : > { %1671 = vst [vmem:[%s4373_s4 + $0x100] sm:$0xff] (%p3381_p10), %v1670_v55  }
 0x28f   : > { %v1200_v57 = vpop.permute.xlu1 %1199 }
 0x290   : > { %2783 = vst.msk [vmem:[%s3501_s30 + $0xa4] sm:$0xf] %vm809_vm0, %v1200_v57  ;;  %v1393_v63 = vpop.permute.xlu0 %1392  ;;  %v1674_v57 = vld [vmem:[%s3501_s30 + $0x88] sm:$0xff] (%p3381_p10)  }
 0x291   : > { %2830 = vst.msk [vmem:[%s3501_s30 + $0xe0] sm:$0xf] %vm809_vm0, %v1393_v63  ;;  %1675 = vst [vmem:[%s4373_s4 + $0x108] sm:$0xff] (%p3381_p10), %v1674_v57   ;;  %v1678_v63 = vld [vmem:[%s3501_s30 + $0x90] sm:$0xff] (%p3381_p10)  }
 0x292   : > { %1679 = vst [vmem:[%s4373_s4 + $0x110] sm:$0xff] (%p3381_p10), %v1678_v63  }
 0x293   : > { %v1395_v2 = vpop.permute.xlu1 %1394  ;;  %v1654_v16 = vld [vmem:[%s3501_s30 + $0x60] sm:$0xff] (%p3381_p10)  }
 0x294   : > { %2831 = vst.msk [vmem:[%s3501_s30 + $0xe4] sm:$0xf] %vm809_vm0, %v1395_v2  ;;  %v1068_v10 = vpop.permute.xlu0 %1067  ;;  %1655 = vst [vmem:[%s4373_s4 + $0xa0] sm:$0xff] (%p3381_p10), %v1654_v16   ;;  %v1682_v2 = vld [vmem:[%s3501_s30 + $0x98] sm:$0xff] (%p3381_p10)  }
 0x295   : > { %2750 = vst.msk [vmem:[%s3519_s11 + $0x60] sm:$0xf] %vm809_vm0, %v1068_v10  ;;  %1683 = vst [vmem:[%s4373_s4 + $0x118] sm:$0xff] (%p3381_p10), %v1682_v2  }
 0x297   : > { %v1070_v3 = vpop.permute.xlu1 %1069  ;;  %v1686_v10 = vld [vmem:[%s3501_s30 + $0xa0] sm:$0xff] (%p3381_p10)  }
 0x298   : > { %2751 = vst.msk [vmem:[%s3519_s11 + $0x64] sm:$0xf] %vm809_vm0, %v1070_v3  ;;  %v1263_v13 = vpop.permute.xlu0 %1262  ;;  %1687 = vst [vmem:[%s4373_s4 + $0x120] sm:$0xff] (%p3381_p10), %v1686_v10  }
 0x299   : > { %2798 = vst.msk [vmem:[%s3519_s11 + $0xa0] sm:$0xf] %vm809_vm0, %v1263_v13 }
 0x29b   : > { %v1265_v19 = vpop.permute.xlu1 %1264 }
 0x29c   : > { %2799 = vst.msk [vmem:[%s3519_s11 + $0xa4] sm:$0xf] %vm809_vm0, %v1265_v19  ;;  %v1458_v40 = vpop.permute.xlu0 %1457 }
 0x29d   : > { %2846 = vst.msk [vmem:[%s3519_s11 + $0xe0] sm:$0xf] %vm809_vm0, %v1458_v40  ;;  %v1702_v40 = vld [vmem:[%s3501_s30 + $0xc0] sm:$0xff] (%p3381_p10)  }
 0x29e   : > { %1703 = vst [vmem:[%s4373_s4 + $0x180] sm:$0xff] (%p3381_p10), %v1702_v40  }
 0x29f   : > { %v1460_v36 = vpop.permute.xlu1 %1459 }
 0x2a0   : > { %2847 = vst.msk [vmem:[%s3519_s11 + $0xe4] sm:$0xf] %vm809_vm0, %v1460_v36  ;;  %v1007_v49 = vpop.permute.xlu0 %1006  ;;  %v1706_v36 = vld [vmem:[%s3501_s30 + $0xc8] sm:$0xff] (%p3381_p10)  }
 0x2a1   : > { %2736 = vst.msk [vmem:[%s3501_s30 + $0x68] sm:$0xf] %vm809_vm0, %v1007_v49  ;;  %v1710_v49 = vld [vmem:[%s3501_s30 + $0xd0] sm:$0xff] (%p3381_p10)   ;;  %1707 = vst [vmem:[%s4373_s4 + $0x188] sm:$0xff] (%p3381_p10), %v1706_v36  }
 0x2a2   : > { %1711 = vst [vmem:[%s4373_s4 + $0x190] sm:$0xff] (%p3381_p10), %v1710_v49  }
 0x2a3   : > { %v1009_v42 = vpop.permute.xlu1 %1008 }
 0x2a4   : > { %2737 = vst.msk [vmem:[%s3501_s30 + $0x6c] sm:$0xf] %vm809_vm0, %v1009_v42  ;;  %v1202_v59 = vpop.permute.xlu0 %1201  ;;  %v1714_v42 = vld [vmem:[%s3501_s30 + $0xd8] sm:$0xff] (%p3381_p10)  }
 0x2a5   : > { %2784 = vst.msk [vmem:[%s3501_s30 + $0xa8] sm:$0xf] %vm809_vm0, %v1202_v59  ;;  %v1718_v59 = vld [vmem:[%s3501_s30 + $0xe0] sm:$0xff] (%p3381_p10)   ;;  %1715 = vst [vmem:[%s4373_s4 + $0x198] sm:$0xff] (%p3381_p10), %v1714_v42  }
 0x2a6   : > { %1719 = vst [vmem:[%s4373_s4 + $0x1a0] sm:$0xff] (%p3381_p10), %v1718_v59  }
 0x2a7   : > { %v1204_v4 = vpop.permute.xlu1 %1203 }
 0x2a8   : > { %2785 = vst.msk [vmem:[%s3501_s30 + $0xac] sm:$0xf] %vm809_vm0, %v1204_v4  ;;  %v1397_v30 = vpop.permute.xlu0 %1396 }
 0x2a9   : > { %2832 = vst.msk [vmem:[%s3501_s30 + $0xe8] sm:$0xf] %vm809_vm0, %v1397_v30 }
 0x2ab   : > { %v1399_v50 = vpop.permute.xlu1 %1398  ;;  %v1658_v25 = vld [vmem:[%s3501_s30 + $0x68] sm:$0xff] (%p3381_p10)  }
 0x2ac   : > { %2833 = vst.msk [vmem:[%s3501_s30 + $0xec] sm:$0xf] %vm809_vm0, %v1399_v50  ;;  %v1072_v53 = vpop.permute.xlu0 %1071  ;;  %1659 = vst [vmem:[%s4373_s4 + $0xa8] sm:$0xff] (%p3381_p10), %v1658_v25  }
 0x2ad   : > { %2752 = vst.msk [vmem:[%s3519_s11 + $0x68] sm:$0xf] %vm809_vm0, %v1072_v53 }
 0x2af   : > { %v1074_v6 = vpop.permute.xlu1 %1073  ;;  %v1690_v3 = vld [vmem:[%s3501_s30 + $0xa8] sm:$0xff] (%p3381_p10)  }
 0x2b0   : > { %2753 = vst.msk [vmem:[%s3519_s11 + $0x6c] sm:$0xf] %vm809_vm0, %v1074_v6  ;;  %v1267_v28 = vpop.permute.xlu0 %1266  ;;  %1691 = vst [vmem:[%s4373_s4 + $0x128] sm:$0xff] (%p3381_p10), %v1690_v3  }
 0x2b1   : > { %2800 = vst.msk [vmem:[%s3519_s11 + $0xa8] sm:$0xf] %vm809_vm0, %v1267_v28 }
 0x2b3   : > { %v1269_v9 = vpop.permute.xlu1 %1268  ;;  %v1722_v4 = vld [vmem:[%s3501_s30 + $0xe8] sm:$0xff] (%p3381_p10)  }
 0x2b4   : > { %2801 = vst.msk [vmem:[%s3519_s11 + $0xac] sm:$0xf] %vm809_vm0, %v1269_v9  ;;  %v1462_v31 = vpop.permute.xlu0 %1461  ;;  %1723 = vst [vmem:[%s4373_s4 + $0x1a8] sm:$0xff] (%p3381_p10), %v1722_v4  }
 0x2b5   : > { %2848 = vst.msk [vmem:[%s3519_s11 + $0xe8] sm:$0xf] %vm809_vm0, %v1462_v31 }
 0x2b7   : > { %v1464_v11 = vpop.permute.xlu1 %1463 }
 0x2b8   : > { %2849 = vst.msk [vmem:[%s3519_s11 + $0xec] sm:$0xf] %vm809_vm0, %v1464_v11  ;;  %v1011_v14 = vpop.permute.xlu0 %1010 }
 0x2b9   : > { %2738 = vst.msk [vmem:[%s3501_s30 + $0x70] sm:$0xf] %vm809_vm0, %v1011_v14 }
 0x2bb   : > { %v1013_v0 = vpop.permute.xlu1 %1012 }
 0x2bc   : > { %2739 = vst.msk [vmem:[%s3501_s30 + $0x74] sm:$0xf] %vm809_vm0, %v1013_v0  ;;  %v1206_v15 = vpop.permute.xlu0 %1205 }
 0x2bd   : > { %2786 = vst.msk [vmem:[%s3501_s30 + $0xb0] sm:$0xf] %vm809_vm0, %v1206_v15 }
 0x2bf   : > { %v1208_v58 = vpop.permute.xlu1 %1207 }
 0x2c0   : > { %2787 = vst.msk [vmem:[%s3501_s30 + $0xb4] sm:$0xf] %vm809_vm0, %v1208_v58  ;;  %v1401_v43 = vpop.permute.xlu0 %1400 }
 0x2c1   : > { %2834 = vst.msk [vmem:[%s3501_s30 + $0xf0] sm:$0xf] %vm809_vm0, %v1401_v43 }
 0x2c3   : > { %v1403_v62 = vpop.permute.xlu1 %1402  ;;  %v1662_v48 = vld [vmem:[%s3501_s30 + $0x70] sm:$0xff] (%p3381_p10)  }
 0x2c4   : > { %2835 = vst.msk [vmem:[%s3501_s30 + $0xf4] sm:$0xf] %vm809_vm0, %v1403_v62  ;;  %v1076_v39 = vpop.permute.xlu0 %1075  ;;  %1663 = vst [vmem:[%s4373_s4 + $0xb0] sm:$0xff] (%p3381_p10), %v1662_v48  }
 0x2c5   : > { %2754 = vst.msk [vmem:[%s3519_s11 + $0x70] sm:$0xf] %vm809_vm0, %v1076_v39 }
 0x2c7   : > { %v1078_v41 = vpop.permute.xlu1 %1077  ;;  %v1694_v13 = vld [vmem:[%s3501_s30 + $0xb0] sm:$0xff] (%p3381_p10)  }
 0x2c8   : > { %2755 = vst.msk [vmem:[%s3519_s11 + $0x74] sm:$0xf] %vm809_vm0, %v1078_v41  ;;  %v1271_v37 = vpop.permute.xlu0 %1270  ;;  %1695 = vst [vmem:[%s4373_s4 + $0x130] sm:$0xff] (%p3381_p10), %v1694_v13  }
 0x2c9   : > { %2802 = vst.msk [vmem:[%s3519_s11 + $0xb0] sm:$0xf] %vm809_vm0, %v1271_v37 }
 0x2cb   : > { %v1273_v27 = vpop.permute.xlu1 %1272  ;;  %v1726_v30 = vld [vmem:[%s3501_s30 + $0xf0] sm:$0xff] (%p3381_p10)  }
 0x2cc   : > { %2803 = vst.msk [vmem:[%s3519_s11 + $0xb4] sm:$0xf] %vm809_vm0, %v1273_v27  ;;  %v1466_v44 = vpop.permute.xlu0 %1465  ;;  %1727 = vst [vmem:[%s4373_s4 + $0x1b0] sm:$0xff] (%p3381_p10), %v1726_v30  }
 0x2cd   : > { %2850 = vst.msk [vmem:[%s3519_s11 + $0xf0] sm:$0xf] %vm809_vm0, %v1466_v44 }
 0x2cf   : > { %v1468_v29 = vpop.permute.xlu1 %1467 }
 0x2d0   : > { %2851 = vst.msk [vmem:[%s3519_s11 + $0xf4] sm:$0xf] %vm809_vm0, %v1468_v29  ;;  %v1015_v32 = vpop.permute.xlu0 %1014 }
 0x2d1   : > { %2740 = vst.msk [vmem:[%s3501_s30 + $0x78] sm:$0xf] %vm809_vm0, %v1015_v32 }
 0x2d3   : > { %v1017_v12 = vpop.permute.xlu1 %1016 }
 0x2d4   : > { %2741 = vst.msk [vmem:[%s3501_s30 + $0x7c] sm:$0xf] %vm809_vm0, %v1017_v12  ;;  %v1210_v20 = vpop.permute.xlu0 %1209 }
 0x2d5   : > { %2788 = vst.msk [vmem:[%s3501_s30 + $0xb8] sm:$0xf] %vm809_vm0, %v1210_v20 }
 0x2d7   : > { %v1212_v45 = vpop.permute.xlu1 %1211 }
 0x2d8   : > { %2789 = vst.msk [vmem:[%s3501_s30 + $0xbc] sm:$0xf] %vm809_vm0, %v1212_v45  ;;  %v1405_v60 = vpop.permute.xlu0 %1404 }
 0x2d9   : > { %2836 = vst.msk [vmem:[%s3501_s30 + $0xf8] sm:$0xf] %vm809_vm0, %v1405_v60 }
 0x2db   : > { %v1407_v22 = vpop.permute.xlu1 %1406  ;;  %v1666_v52 = vld [vmem:[%s3501_s30 + $0x78] sm:$0xff] (%p3381_p10)  }
 0x2dc   : > { %2837 = vst.msk [vmem:[%s3501_s30 + $0xfc] sm:$0xf] %vm809_vm0, %v1407_v22  ;;  %v1080_v47 = vpop.permute.xlu0 %1079  ;;  %1667 = vst [vmem:[%s4373_s4 + $0xb8] sm:$0xff] (%p3381_p10), %v1666_v52  }
 0x2dd   : > { %2756 = vst.msk [vmem:[%s3519_s11 + $0x78] sm:$0xf] %vm809_vm0, %v1080_v47 }
 0x2df   : > { %v1082_v51 = vpop.permute.xlu1 %1081  ;;  %v1698_v19 = vld [vmem:[%s3501_s30 + $0xb8] sm:$0xff] (%p3381_p10)  }
 0x2e0   : > { %2757 = vst.msk [vmem:[%s3519_s11 + $0x7c] sm:$0xf] %vm809_vm0, %v1082_v51  ;;  %v1275_v56 = vpop.permute.xlu0 %1274  ;;  %1699 = vst [vmem:[%s4373_s4 + $0x138] sm:$0xff] (%p3381_p10), %v1698_v19  }
 0x2e1   : > { %2804 = vst.msk [vmem:[%s3519_s11 + $0xb8] sm:$0xf] %vm809_vm0, %v1275_v56 }
 0x2e3   : > { %v1277_v54 = vpop.permute.xlu1 %1276  ;;  %v1730_v50 = vld [vmem:[%s3501_s30 + $0xf8] sm:$0xff] (%p3381_p10)  }
 0x2e4   : > { %2805 = vst.msk [vmem:[%s3519_s11 + $0xbc] sm:$0xf] %vm809_vm0, %v1277_v54  ;;  %v1470_v61 = vpop.permute.xlu0 %1469  ;;  %1731 = vst [vmem:[%s4373_s4 + $0x1b8] sm:$0xff] (%p3381_p10), %v1730_v50  }
 0x2e5   : > { %2852 = vst.msk [vmem:[%s3519_s11 + $0xf8] sm:$0xf] %vm809_vm0, %v1470_v61 }
 0x2e6   : > { %1585 = sbr.rel (!%p3381_p10) target bundleno = 749 (0x2ed), region = 44 }
 0x2e7   : > { %v1472_v23 = vpop.permute.xlu1 %1471 }
 0x2e8   : > { %2853 = vst.msk [vmem:[%s3519_s11 + $0xfc] sm:$0xf] %vm809_vm0, %v1472_v23  ;;  %v1535_v33 = vpop.permute.xlu0 %1534 }
 0x2e9   : > { %2868 = vst.msk [vmem:[%s3507_s28 + $0xf8] sm:$0xf] %vm809_vm0, %v1535_v33 }
 0x2eb   : > { %v1537_v34 = vpop.permute.xlu1 %1536 }
 0x2ec   : > { %2869 = vst.msk [vmem:[%s3507_s28 + $0xfc] sm:$0xf] %vm809_vm0, %v1537_v34 }
 0x2ed PF: > { %1884 = sbr.rel (!%p3381_p10) target bundleno = 773 (0x305), region = 85  ;;  %s2876_s5 = sshll.u32 (%p3381_p10), %s3222_s21, 4  ;;  %v1905_v53 = vld [vmem:[%s3519_s11] sm:$0xff] (%p3381_p10)   ;;  %v1909_v6 = vld [vmem:[%s3519_s11 + $0x8] sm:$0xff] (%p3381_p10)   ;;  %v1913_v28 = vld [vmem:[%s3519_s11 + $0x10] sm:$0xff] (%p3381_p10)  }
 0x2ee   : > { %s2877_s9 = sshll.u32 (%p3381_p10), %s3226_s22, 7  ;;  %v1917_v9 = vld [vmem:[%s3519_s11 + $0x18] sm:$0xff] (%p3381_p10)   ;;  %v1921_v31 = vld [vmem:[%s3519_s11 + $0x20] sm:$0xff] (%p3381_p10)   ;;  %v1925_v11 = vld [vmem:[%s3519_s11 + $0x28] sm:$0xff] (%p3381_p10)   ;;  %s4630_s12 = sld [smem:[#allocation14_spill]] (%p3381_p10) }
 0x2ef   : > { %s1887_s3 = sadd.s32 (%p3381_p10), %s2877_s9, %s2876_s5  ;;  %v1929_v14 = vld [vmem:[%s3519_s11 + $0x30] sm:$0xff] (%p3381_p10)   ;;  %v1933_v0 = vld [vmem:[%s3519_s11 + $0x38] sm:$0xff] (%p3381_p10)   ;;  %v1937_v15 = vld [vmem:[%s3519_s11 + $0x40] sm:$0xff] (%p3381_p10)  }
 0x2f0   : > { %s2878_s27 = sshll.u32 (%p3381_p10), %s1887_s3, 2  ;;  %v1941_v58 = vld [vmem:[%s3519_s11 + $0x48] sm:$0xff] (%p3381_p10)   ;;  %v1945_v43 = vld [vmem:[%s3519_s11 + $0x50] sm:$0xff] (%p3381_p10)   ;;  %v1949_v62 = vld [vmem:[%s3519_s11 + $0x58] sm:$0xff] (%p3381_p10)  }
 0x2f1   : > { %v1953_v39 = vld [vmem:[%s3519_s11 + $0x60] sm:$0xff] (%p3381_p10)   ;;  %v1957_v41 = vld [vmem:[%s3519_s11 + $0x68] sm:$0xff] (%p3381_p10)   ;;  %v1961_v37 = vld [vmem:[%s3519_s11 + $0x70] sm:$0xff] (%p3381_p10)  }
 0x2f2   : > { %v1965_v27 = vld [vmem:[%s3519_s11 + $0x78] sm:$0xff] (%p3381_p10)   ;;  %v1969_v44 = vld [vmem:[%s3519_s11 + $0x80] sm:$0xff] (%p3381_p10)   ;;  %v1973_v29 = vld [vmem:[%s3519_s11 + $0x88] sm:$0xff] (%p3381_p10)  }
 0x2f3   : > { %v1977_v32 = vld [vmem:[%s3519_s11 + $0x90] sm:$0xff] (%p3381_p10)   ;;  %v1981_v12 = vld [vmem:[%s3519_s11 + $0x98] sm:$0xff] (%p3381_p10)   ;;  %v1985_v20 = vld [vmem:[%s3519_s11 + $0xa0] sm:$0xff] (%p3381_p10)  }
 0x2f4   : > { %s4446_s8 = scalar_lea.vmem %s4630_s12, %s2878_s27  ;;  %v1989_v45 = vld [vmem:[%s3519_s11 + $0xa8] sm:$0xff]   ;;  %v1993_v60 = vld [vmem:[%s3519_s11 + $0xb0] sm:$0xff]   ;;  %v1997_v22 = vld [vmem:[%s3519_s11 + $0xb8] sm:$0xff]  }
 0x2f5   : > { %1906 = vst [vmem:[%s4446_s8] sm:$0xff] %v1905_v53   ;;  %1910 = vst [vmem:[%s4446_s8 + $0x8] sm:$0xff] %v1909_v6   ;;  %v2001_v47 = vld [vmem:[%s3519_s11 + $0xc0] sm:$0xff]   ;;  %v2005_v51 = vld [vmem:[%s3519_s11 + $0xc8] sm:$0xff]  }
 0x2f6   : > { %1914 = vst [vmem:[%s4446_s8 + $0x10] sm:$0xff] %v1913_v28   ;;  %1918 = vst [vmem:[%s4446_s8 + $0x18] sm:$0xff] %v1917_v9   ;;  %v2009_v56 = vld [vmem:[%s3519_s11 + $0xd0] sm:$0xff]   ;;  %v2013_v54 = vld [vmem:[%s3519_s11 + $0xd8] sm:$0xff]  }
 0x2f7   : > { %1922 = vst [vmem:[%s4446_s8 + $0x20] sm:$0xff] %v1921_v31   ;;  %1926 = vst [vmem:[%s4446_s8 + $0x28] sm:$0xff] %v1925_v11   ;;  %v2017_v61 = vld [vmem:[%s3519_s11 + $0xe0] sm:$0xff]   ;;  %v2021_v23 = vld [vmem:[%s3519_s11 + $0xe8] sm:$0xff]  }
 0x2f8   : > { %1930 = vst [vmem:[%s4446_s8 + $0x30] sm:$0xff] %v1929_v14   ;;  %1934 = vst [vmem:[%s4446_s8 + $0x38] sm:$0xff] %v1933_v0   ;;  %v2025_v33 = vld [vmem:[%s3519_s11 + $0xf0] sm:$0xff]   ;;  %v2029_v34 = vld [vmem:[%s3519_s11 + $0xf8] sm:$0xff]  }
 0x2f9   : > { %1938 = vst [vmem:[%s4446_s8 + $0x80] sm:$0xff] %v1937_v15   ;;  %1942 = vst [vmem:[%s4446_s8 + $0x88] sm:$0xff] %v1941_v58  }
 0x2fa   : > { %1946 = vst [vmem:[%s4446_s8 + $0x90] sm:$0xff] %v1945_v43   ;;  %1950 = vst [vmem:[%s4446_s8 + $0x98] sm:$0xff] %v1949_v62  }
 0x2fb   : > { %1954 = vst [vmem:[%s4446_s8 + $0xa0] sm:$0xff] %v1953_v39   ;;  %1958 = vst [vmem:[%s4446_s8 + $0xa8] sm:$0xff] %v1957_v41  }
 0x2fc   : > { %1962 = vst [vmem:[%s4446_s8 + $0xb0] sm:$0xff] %v1961_v37   ;;  %1966 = vst [vmem:[%s4446_s8 + $0xb8] sm:$0xff] %v1965_v27  }
 0x2fd   : > { %1970 = vst [vmem:[%s4446_s8 + $0x100] sm:$0xff] %v1969_v44   ;;  %1974 = vst [vmem:[%s4446_s8 + $0x108] sm:$0xff] %v1973_v29  }
 0x2fe   : > { %1978 = vst [vmem:[%s4446_s8 + $0x110] sm:$0xff] %v1977_v32   ;;  %1982 = vst [vmem:[%s4446_s8 + $0x118] sm:$0xff] %v1981_v12  }
 0x2ff   : > { %1986 = vst [vmem:[%s4446_s8 + $0x120] sm:$0xff] %v1985_v20   ;;  %1990 = vst [vmem:[%s4446_s8 + $0x128] sm:$0xff] %v1989_v45  }
 0x300   : > { %1994 = vst [vmem:[%s4446_s8 + $0x130] sm:$0xff] %v1993_v60   ;;  %1998 = vst [vmem:[%s4446_s8 + $0x138] sm:$0xff] %v1997_v22  }
 0x301   : > { %2002 = vst [vmem:[%s4446_s8 + $0x180] sm:$0xff] %v2001_v47   ;;  %2006 = vst [vmem:[%s4446_s8 + $0x188] sm:$0xff] %v2005_v51  }
 0x302   : > { %2010 = vst [vmem:[%s4446_s8 + $0x190] sm:$0xff] %v2009_v56   ;;  %2014 = vst [vmem:[%s4446_s8 + $0x198] sm:$0xff] %v2013_v54  }
 0x303   : > { %2018 = vst [vmem:[%s4446_s8 + $0x1a0] sm:$0xff] %v2017_v61   ;;  %2022 = vst [vmem:[%s4446_s8 + $0x1a8] sm:$0xff] %v2021_v23  }
 0x304   : > { %2026 = vst [vmem:[%s4446_s8 + $0x1b0] sm:$0xff] %v2025_v33   ;;  %2030 = vst [vmem:[%s4446_s8 + $0x1b8] sm:$0xff] %v2029_v34  }
 0x305 PF: > { %2183 = sbr.rel (!%p3381_p10) target bundleno = 797 (0x31d), region = 126  ;;  %s2879_s11 = sshll.u32 (%p3381_p10), %s3222_s21, 4  ;;  %v2204_v8 = vld [vmem:[%s3507_s28] sm:$0xff] (%p3381_p10)   ;;  %v2208_v35 = vld [vmem:[%s3507_s28 + $0x8] sm:$0xff] (%p3381_p10)   ;;  %v2212_v21 = vld [vmem:[%s3507_s28 + $0x10] sm:$0xff] (%p3381_p10)  }
 0x306   : > { %s2880_s15 = sshll.u32 (%p3381_p10), %s3226_s22, 7  ;;  %v2216_v38 = vld [vmem:[%s3507_s28 + $0x18] sm:$0xff] (%p3381_p10)   ;;  %v2220_v46 = vld [vmem:[%s3507_s28 + $0x20] sm:$0xff] (%p3381_p10)   ;;  %v2224_v18 = vld [vmem:[%s3507_s28 + $0x28] sm:$0xff] (%p3381_p10)   ;;  %s4631_s18 = sld [smem:[#allocation15_spill]] (%p3381_p10) }
 0x307   : > { %s2186_s7 = sadd.s32 (%p3381_p10), %s2880_s15, %s2879_s11  ;;  %v2228_v1 = vld [vmem:[%s3507_s28 + $0x30] sm:$0xff] (%p3381_p10)   ;;  %v2232_v26 = vld [vmem:[%s3507_s28 + $0x38] sm:$0xff] (%p3381_p10)   ;;  %v2236_v5 = vld [vmem:[%s3507_s28 + $0x40] sm:$0xff] (%p3381_p10)  }
 0x308   : > { %s2881_s13 = sshll.u32 (%p3381_p10), %s2186_s7, 2  ;;  %v2240_v7 = vld [vmem:[%s3507_s28 + $0x48] sm:$0xff] (%p3381_p10)   ;;  %v2244_v24 = vld [vmem:[%s3507_s28 + $0x50] sm:$0xff] (%p3381_p10)   ;;  %v2248_v17 = vld [vmem:[%s3507_s28 + $0x58] sm:$0xff] (%p3381_p10)  }
 0x309   : > { %v2252_v16 = vld [vmem:[%s3507_s28 + $0x60] sm:$0xff] (%p3381_p10)   ;;  %v2256_v25 = vld [vmem:[%s3507_s28 + $0x68] sm:$0xff] (%p3381_p10)   ;;  %v2260_v48 = vld [vmem:[%s3507_s28 + $0x70] sm:$0xff] (%p3381_p10)  }
 0x30a   : > { %v2264_v52 = vld [vmem:[%s3507_s28 + $0x78] sm:$0xff] (%p3381_p10)   ;;  %v2268_v55 = vld [vmem:[%s3507_s28 + $0x80] sm:$0xff] (%p3381_p10)   ;;  %v2272_v57 = vld [vmem:[%s3507_s28 + $0x88] sm:$0xff] (%p3381_p10)  }
 0x30b   : > { %v2276_v63 = vld [vmem:[%s3507_s28 + $0x90] sm:$0xff] (%p3381_p10)   ;;  %v2280_v2 = vld [vmem:[%s3507_s28 + $0x98] sm:$0xff] (%p3381_p10)   ;;  %v2284_v10 = vld [vmem:[%s3507_s28 + $0xa0] sm:$0xff] (%p3381_p10)  }
 0x30c   : > { %s4519_s26 = scalar_lea.vmem %s4631_s18, %s2881_s13  ;;  %v2288_v3 = vld [vmem:[%s3507_s28 + $0xa8] sm:$0xff]   ;;  %v2292_v13 = vld [vmem:[%s3507_s28 + $0xb0] sm:$0xff]   ;;  %v2296_v19 = vld [vmem:[%s3507_s28 + $0xb8] sm:$0xff]  }
 0x30d   : > { %2205 = vst [vmem:[%s4519_s26] sm:$0xff] %v2204_v8   ;;  %2209 = vst [vmem:[%s4519_s26 + $0x8] sm:$0xff] %v2208_v35   ;;  %v2300_v40 = vld [vmem:[%s3507_s28 + $0xc0] sm:$0xff]   ;;  %v2304_v36 = vld [vmem:[%s3507_s28 + $0xc8] sm:$0xff]  }
 0x30e   : > { %2213 = vst [vmem:[%s4519_s26 + $0x10] sm:$0xff] %v2212_v21   ;;  %2217 = vst [vmem:[%s4519_s26 + $0x18] sm:$0xff] %v2216_v38   ;;  %v2308_v49 = vld [vmem:[%s3507_s28 + $0xd0] sm:$0xff]   ;;  %v2312_v42 = vld [vmem:[%s3507_s28 + $0xd8] sm:$0xff]  }
 0x30f   : > { %2221 = vst [vmem:[%s4519_s26 + $0x20] sm:$0xff] %v2220_v46   ;;  %2225 = vst [vmem:[%s4519_s26 + $0x28] sm:$0xff] %v2224_v18   ;;  %v2316_v59 = vld [vmem:[%s3507_s28 + $0xe0] sm:$0xff]   ;;  %v2320_v4 = vld [vmem:[%s3507_s28 + $0xe8] sm:$0xff]  }
 0x310   : > { %2229 = vst [vmem:[%s4519_s26 + $0x30] sm:$0xff] %v2228_v1   ;;  %2233 = vst [vmem:[%s4519_s26 + $0x38] sm:$0xff] %v2232_v26   ;;  %v2324_v30 = vld [vmem:[%s3507_s28 + $0xf0] sm:$0xff]   ;;  %v2328_v50 = vld [vmem:[%s3507_s28 + $0xf8] sm:$0xff]  }
 0x311   : > { %2237 = vst [vmem:[%s4519_s26 + $0x80] sm:$0xff] %v2236_v5   ;;  %2241 = vst [vmem:[%s4519_s26 + $0x88] sm:$0xff] %v2240_v7  }
 0x312   : > { %2245 = vst [vmem:[%s4519_s26 + $0x90] sm:$0xff] %v2244_v24   ;;  %2249 = vst [vmem:[%s4519_s26 + $0x98] sm:$0xff] %v2248_v17  }
 0x313   : > { %2253 = vst [vmem:[%s4519_s26 + $0xa0] sm:$0xff] %v2252_v16   ;;  %2257 = vst [vmem:[%s4519_s26 + $0xa8] sm:$0xff] %v2256_v25  }
 0x314   : > { %2261 = vst [vmem:[%s4519_s26 + $0xb0] sm:$0xff] %v2260_v48   ;;  %2265 = vst [vmem:[%s4519_s26 + $0xb8] sm:$0xff] %v2264_v52  }
 0x315   : > { %2269 = vst [vmem:[%s4519_s26 + $0x100] sm:$0xff] %v2268_v55   ;;  %2273 = vst [vmem:[%s4519_s26 + $0x108] sm:$0xff] %v2272_v57  }
 0x316   : > { %2277 = vst [vmem:[%s4519_s26 + $0x110] sm:$0xff] %v2276_v63   ;;  %2281 = vst [vmem:[%s4519_s26 + $0x118] sm:$0xff] %v2280_v2  }
 0x317   : > { %2285 = vst [vmem:[%s4519_s26 + $0x120] sm:$0xff] %v2284_v10   ;;  %2289 = vst [vmem:[%s4519_s26 + $0x128] sm:$0xff] %v2288_v3  }
 0x318   : > { %2293 = vst [vmem:[%s4519_s26 + $0x130] sm:$0xff] %v2292_v13   ;;  %2297 = vst [vmem:[%s4519_s26 + $0x138] sm:$0xff] %v2296_v19  }
 0x319   : > { %2301 = vst [vmem:[%s4519_s26 + $0x180] sm:$0xff] %v2300_v40   ;;  %2305 = vst [vmem:[%s4519_s26 + $0x188] sm:$0xff] %v2304_v36  }
 0x31a   : > { %2309 = vst [vmem:[%s4519_s26 + $0x190] sm:$0xff] %v2308_v49   ;;  %2313 = vst [vmem:[%s4519_s26 + $0x198] sm:$0xff] %v2312_v42  }
 0x31b   : > { %2317 = vst [vmem:[%s4519_s26 + $0x1a0] sm:$0xff] %v2316_v59   ;;  %2321 = vst [vmem:[%s4519_s26 + $0x1a8] sm:$0xff] %v2320_v4  }
 0x31c   : > { %2325 = vst [vmem:[%s4519_s26 + $0x1b0] sm:$0xff] %v2324_v30   ;;  %2329 = vst [vmem:[%s4519_s26 + $0x1b8] sm:$0xff] %v2328_v50  }
 0x31d PF: > { %s20_s25 = sadd.s32 1, %s3238_s25   ;;  %s4632_s6 = sld [smem:[#allocation11_spill]] }
 0x31e   : > { %p17_p10 = scmp.ge.s32.totalorder %s20_s25, 6   ;;  %s4633_s18 = smov %s3214_s19 }
 0x31f   : > { %s4634_s19 = smov %s3218_s20  ;;  %s4635_s20 = smov %s3394_s1 }
 0x320   : > { %s4636_s21 = smov %s3230_s23  ;;  %s4637_s22 = smov %s3234_s24 }
 0x321   : > { %s4639_s24 = smov %s4645_s10  ;;  %19 = sbr.rel (!%p17_p10) target bundleno = 11 (0xb), region = 232 }
 0x323   : > { %s4638_s23 = smov %s4632_s6 }
 0x328   :  { %2506 = vsyncpa [#allocation3], 1 }
 0x329   :  { %2508 = vsyncpa [#allocation3 + $0x1], 1 }
 0x32a   :  { %2509 = vsyncpa [#allocation5], 1 }

</bundles_post_ra>
